<compile_context>
chip_gen: v5e
topology: v5e:2x2
jax: 0.10.0
libtpu: 0.0.40
codegen_flags: <defaults>
</compile_context>

<pallas_src>
import jax
import jax.numpy as jnp
from jax.experimental import pallas as pl
from jax.experimental.pallas import tpu as pltpu


def classifier_kernel(x_ref, w1_ref, b1_ref, w2_ref, b2_ref, o_ref):
    # x_ref : (TB, S, D)   one tile of batch rows per grid step
    # w1_ref: (D, D)    b1_ref: (1, D)
    # w2_ref: (D, Cp)   b2_ref: (1, Cp)   (Cp = classes padded to lane multiple)
    # o_ref : (TB, Cp)
    x = x_ref[...]                                                 # (TB, S, D)

    # Mean over the sequence axis FIRST (exact; mean commutes with the affine
    # proj layer), so the proj matmul runs on (TB, D) instead of (TB*S, D).
    m = jnp.mean(x, axis=1)                                        # (TB, D)

    # proj: Linear(D, D)
    h = jnp.dot(m, w1_ref[...],
                preferred_element_type=jnp.float32) + b1_ref[...]  # (TB, D)

    # cls: Linear(D, Cp) + Softplus (PyTorch default beta=1, threshold=20)
    logits = jnp.dot(h, w2_ref[...],
                     preferred_element_type=jnp.float32) + b2_ref[...]  # (TB, Cp)
    sp = jnp.where(logits > 20.0,
                   logits,
                   jnp.log1p(jnp.exp(jnp.minimum(logits, 20.0))))

    o_ref[...] = sp


def classifier_forward(x, w1, b1, w2, b2, *, block_b=None):
    """x: (B, S, D) float32, w1: (D, D), b1: (1, D), w2: (D, C), b2: (1, C) -> (B, C)."""
    B, S, D = x.shape
    C = w2.shape[1]

    # Lane-dense output: pad the class dim up to a multiple of 128 with zero
    # weight columns / bias lanes; slice back after the call.
    Cp = ((C + 127) // 128) * 128
    if Cp != C:
        w2 = jnp.pad(w2, ((0, 0), (0, Cp - C)))
        b2 = jnp.pad(b2, ((0, 0), (0, Cp - C)))

    # Batch tile size: sublane-aligned (multiple of 8), capped so the
    # double-buffered x tile stays well inside VMEM (v7x has 64 MiB total).
    if block_b is None:
        block_b = 128
        bytes_per_row = S * D * 4
        vmem_rows = max(8, ((8 * 1024 * 1024) // max(bytes_per_row, 1)) // 8 * 8)
        block_b = min(block_b, vmem_rows)
    block_b = max(8, (block_b // 8) * 8)

    # Pad batch up to a multiple of block_b; padded rows are dead work that is
    # sliced off (cheap at these sizes).
    g = -(-B // block_b)                  # number of grid steps
    Bp = g * block_b
    if Bp != B:
        x = jnp.pad(x, ((0, Bp - B), (0, 0), (0, 0)))

    out = pl.pallas_call(
        classifier_kernel,
        out_shape=jax.ShapeDtypeStruct((Bp, Cp), jnp.float32),
        grid_spec=pltpu.PrefetchScalarGridSpec(
            num_scalar_prefetch=0,
            grid=(g,),
            in_specs=[
                pl.BlockSpec((block_b, S, D), lambda b: (b, 0, 0)),  # x tile
                pl.BlockSpec((D, D),          lambda b: (0, 0)),     # proj weight (in, out)
                pl.BlockSpec((1, D),          lambda b: (0, 0)),     # proj bias
                pl.BlockSpec((D, Cp),         lambda b: (0, 0)),     # cls weight (in, out), lane-padded
                pl.BlockSpec((1, Cp),         lambda b: (0, 0)),     # cls bias, lane-padded
            ],
            out_specs=pl.BlockSpec((block_b, Cp), lambda b: (b, 0)),
        ),
        compiler_params=pltpu.CompilerParams(
            dimension_semantics=("parallel",)),
    )(x, w1, b1, w2, b2)

    # TODO(synk): for very large D the proj weight's K axis could be tiled with
    # a trailing "arbitrary" grid axis; unnecessary at these sizes.
    return out[:B, :C]


def reference_forward(x, w1, b1, w2, b2):
    # Reference follows the original PyTorch op order: proj -> mean -> cls.
    h = jnp.einsum("bsd,de->bse", x, w1) + b1
    m = h.mean(axis=1)
    logits = m @ w2 + b2
    return jnp.where(logits > 20.0, logits,
                     jnp.log1p(jnp.exp(jnp.minimum(logits, 20.0))))


if __name__ == "__main__":
    B, S, D, C = 2, 8, 32, 10   # batch, seq, classifier_dims, classes

    key = jax.random.PRNGKey(0)
    kx, k1, k2, k3, k4 = jax.random.split(key, 5)

    x = jax.random.normal(kx, (B, S, D), dtype=jnp.float32)

    # Deterministic parameter init (PyTorch Linear-style uniform(-1/sqrt(fan_in), 1/sqrt(fan_in)))
    bound1 = 1.0 / (D ** 0.5)
    w1 = jax.random.uniform(k1, (D, D), jnp.float32, -bound1, bound1)   # (in, out)
    b1 = jax.random.uniform(k2, (1, D), jnp.float32, -bound1, bound1)
    bound2 = 1.0 / (D ** 0.5)
    w2 = jax.random.uniform(k3, (D, C), jnp.float32, -bound2, bound2)   # (in, out)
    b2 = jax.random.uniform(k4, (1, C), jnp.float32, -bound2, bound2)

    out = classifier_forward(x, w1, b1, w2, b2)
    out = jax.block_until_ready(out)

    ref = reference_forward(x, w1, b1, w2, b2)
    assert out.shape == (B, C)
    assert jnp.allclose(out, ref, atol=1e-5, rtol=1e-5), "mismatch vs JAX reference"

    print("KERNEL_OK")
</pallas_src>

<mosaic_0001>
module attributes {stable_mosaic.version = 11 : i64} {
  func.func @classifier_kernel(%arg0: i32, %arg1: memref<128x8x32xf32, #tpu.memory_space<vmem>>, %arg2: memref<32x32xf32, #tpu.memory_space<vmem>>, %arg3: memref<1x32xf32, #tpu.memory_space<vmem>>, %arg4: memref<32x128xf32, #tpu.memory_space<vmem>>, %arg5: memref<1x128xf32, #tpu.memory_space<vmem>>, %arg6: memref<128x128xf32, #tpu.memory_space<vmem>>) attributes {dimension_semantics = [#tpu.dimension_semantics<parallel>], iteration_bounds = array<i64: 1>, scalar_prefetch = 0 : i64, scratch_operands = 0 : i64, tpu.core_type = #tpu.core_type<tc>, window_params = [{transform_indices = @transform_0, window_bounds = array<i64: 128, 8, 32>}, {pipeline_mode = #tpu.pipeline_mode<synchronous>, transform_indices = @transform_1, window_bounds = array<i64: 32, 32>}, {pipeline_mode = #tpu.pipeline_mode<synchronous>, transform_indices = @transform_2, window_bounds = array<i64: 1, 32>}, {pipeline_mode = #tpu.pipeline_mode<synchronous>, transform_indices = @transform_3, window_bounds = array<i64: 32, 128>}, {pipeline_mode = #tpu.pipeline_mode<synchronous>, transform_indices = @transform_4, window_bounds = array<i64: 1, 128>}, {transform_indices = @transform_5, window_bounds = array<i64: 128, 128>}]} {
    %c0 = arith.constant 0 : index
    %c0_0 = arith.constant 0 : index
    %c0_1 = arith.constant 0 : index
    %0 = vector.load %arg1[%c0, %c0_0, %c0_1] : memref<128x8x32xf32, #tpu.memory_space<vmem>>, vector<128x8x32xf32>
    %cst = arith.constant dense<0.000000e+00> : vector<128x32xf32>
    %1 = vector.multi_reduction <add>, %0, %cst [1] : vector<128x8x32xf32> to vector<128x32xf32>
    %cst_2 = arith.constant 8.000000e+00 : f32
    %2 = vector.broadcast %cst_2 : f32 to vector<128x32xf32>
    %3 = arith.divf %1, %2 : vector<128x32xf32>
    %c0_3 = arith.constant 0 : index
    %c0_4 = arith.constant 0 : index
    %4 = vector.load %arg2[%c0_3, %c0_4] : memref<32x32xf32, #tpu.memory_space<vmem>>, vector<32x32xf32>
    %cst_5 = arith.constant dense<0.000000e+00> : vector<128x32xf32>
    %5 = tpu.matmul %3, %4, %cst_5 {dimension_numbers = #tpu.dot_dimension_numbers<[1], [0], [0], [1], [0, 0, 1, 1], [], []>} : vector<128x32xf32>, vector<32x32xf32>, vector<128x32xf32> -> vector<128x32xf32>
    %c0_6 = arith.constant 0 : index
    %c0_7 = arith.constant 0 : index
    %6 = vector.load %arg3[%c0_6, %c0_7] : memref<1x32xf32, #tpu.memory_space<vmem>>, vector<1x32xf32>
    %7 = vector.broadcast %6 : vector<1x32xf32> to vector<128x32xf32>
    %8 = arith.addf %5, %7 : vector<128x32xf32>
    %c0_8 = arith.constant 0 : index
    %c0_9 = arith.constant 0 : index
    %9 = vector.load %arg4[%c0_8, %c0_9] : memref<32x128xf32, #tpu.memory_space<vmem>>, vector<32x128xf32>
    %cst_10 = arith.constant dense<0.000000e+00> : vector<128x128xf32>
    %10 = tpu.matmul %8, %9, %cst_10 {dimension_numbers = #tpu.dot_dimension_numbers<[1], [0], [0], [1], [0, 0, 1, 1], [], []>} : vector<128x32xf32>, vector<32x128xf32>, vector<128x128xf32> -> vector<128x128xf32>
    %c0_11 = arith.constant 0 : index
    %c0_12 = arith.constant 0 : index
    %11 = vector.load %arg5[%c0_11, %c0_12] : memref<1x128xf32, #tpu.memory_space<vmem>>, vector<1x128xf32>
    %12 = vector.broadcast %11 : vector<1x128xf32> to vector<128x128xf32>
    %13 = arith.addf %10, %12 : vector<128x128xf32>
    %cst_13 = arith.constant 2.000000e+01 : f32
    %14 = vector.broadcast %cst_13 : f32 to vector<128x128xf32>
    %15 = arith.cmpf ogt, %13, %14 : vector<128x128xf32>
    %cst_14 = arith.constant 2.000000e+01 : f32
    %16 = vector.broadcast %cst_14 : f32 to vector<128x128xf32>
    %17 = arith.minimumf %13, %16 : vector<128x128xf32>
    %18 = math.exp %17 : vector<128x128xf32>
    %19 = math.log1p %18 : vector<128x128xf32>
    %20 = arith.select %15, %13, %19 : vector<128x128xi1>, vector<128x128xf32>
    %c0_15 = arith.constant 0 : index
    %c0_16 = arith.constant 0 : index
    %21 = vector.load %arg6[%c0_15, %c0_16] : memref<128x128xf32, #tpu.memory_space<vmem>>, vector<128x128xf32>
    tpu.vector_store %arg6[%c0_15, %c0_16], %20 {strides = array<i32>} : memref<128x128xf32, #tpu.memory_space<vmem>>, vector<128x128xf32>,
    return
  }
  func.func @transform_0(%arg0: i32) -> (i32, i32, i32) {
    %c0_i32 = arith.constant 0 : i32
    %c0_i32_0 = arith.constant 0 : i32
    %c0_i32_1 = arith.constant 0 : i32
    return %arg0, %c0_i32, %c0_i32_0 : i32, i32, i32
  }
  func.func @transform_1(%arg0: i32) -> (i32, i32) {
    %c0_i32 = arith.constant 0 : i32
    %c0_i32_0 = arith.constant 0 : i32
    %c0_i32_1 = arith.constant 0 : i32
    return %c0_i32, %c0_i32_0 : i32, i32
  }
  func.func @transform_2(%arg0: i32) -> (i32, i32) {
    %c0_i32 = arith.constant 0 : i32
    %c0_i32_0 = arith.constant 0 : i32
    %c0_i32_1 = arith.constant 0 : i32
    return %c0_i32, %c0_i32_0 : i32, i32
  }
  func.func @transform_3(%arg0: i32) -> (i32, i32) {
    %c0_i32 = arith.constant 0 : i32
    %c0_i32_0 = arith.constant 0 : i32
    %c0_i32_1 = arith.constant 0 : i32
    return %c0_i32, %c0_i32_0 : i32, i32
  }
  func.func @transform_4(%arg0: i32) -> (i32, i32) {
    %c0_i32 = arith.constant 0 : i32
    %c0_i32_0 = arith.constant 0 : i32
    %c0_i32_1 = arith.constant 0 : i32
    return %c0_i32, %c0_i32_0 : i32, i32
  }
  func.func @transform_5(%arg0: i32) -> (i32, i32) {
    %c0_i32 = arith.constant 0 : i32
    %c0_i32_0 = arith.constant 0 : i32
    return %arg0, %c0_i32 : i32, i32
  }
}

</mosaic_0001>

<bundles_post_ra>
// kernel: tpu_custom_call.1
= control target key start
LH: loop header
LB: loop body
LE: loop exit
PB: predicated region body
PF: predicated region fallthrough
CT: control target
= control target key end

     0   :  { %vm149_vm0 = vcmask 261120   ;;  %v2050_v16 = vmov 8.0   ;;  %s3022_s0 = inlined_call_operand.vmem [shape: f32[128,8,32], index: 0, kind: input, shape index: {}]   ;;  %s3023_s1 = inlined_call_operand.vmem [shape: f32[32,32], index: 1, kind: input, shape index: {}]   ;;  %s3024_s2 = inlined_call_operand.vmem [shape: f32[1,32], index: 2, kind: input, shape index: {}]   ;;  %s3025_s3 = inlined_call_operand.vmem [shape: f32[32,128], index: 3, kind: input, shape index: {}]   ;;  %s3026_s4 = inlined_call_operand.vmem [shape: f32[1,128], index: 4, kind: input, shape index: {}]   ;;  %s3027_s5 = inlined_call_operand.hbm [shape: f32[128,128], index: 5, kind: output, shape index: {}]  }
   0x1   :  { %v1184_v0 = vld [vmem:[%s3023_s1 + $0x18] sm:$0xff]  ;;  %v1183_v1 = vld [vmem:[%s3023_s1 + $0x10] sm:$0xff]  ;;  %v1182_v2 = vld [vmem:[%s3023_s1 + $0x8] sm:$0xff]  ;;  %1958 = vrcp.f32 %v2050_v16 }
   0x2   :  { %1480 = vmatpush.msra.mxu0 %v1184_v0  ;;  %1944 = vmatpush.msra.mxu2 %v1184_v0  ;;  %v21_v3 = vld [vmem:[%s3022_s0] sm:$0xff]  ;;  %v22_v4 = vld [vmem:[%s3022_s0 + $0x8] sm:$0xff]  ;;  %v23_v5 = vld [vmem:[%s3022_s0 + $0x10] sm:$0xff] }
   0x3   :  { %v24_v6 = vld [vmem:[%s3022_s0 + $0x18] sm:$0xff]  ;;  %v25_v7 = vld [vmem:[%s3022_s0 + $0x20] sm:$0xff]  ;;  %v150_v8 = vsel %vm149_vm0, %v21_v3, 0.0  ;;  %v157_v9 = vsel %vm149_vm0, %v22_v4, 0.0  ;;  %v26_v10 = vld [vmem:[%s3022_s0 + $0x28] sm:$0xff]  ;;  %v164_v15 = vsel %vm149_vm0, %v23_v5, 0.0 }
   0x4   :  { %1481 = vmatpush.msra.mxu0 %v1183_v1  ;;  %1945 = vmatpush.msra.mxu2 %v1183_v1  ;;  %v27_v11 = vld [vmem:[%s3022_s0 + $0x30] sm:$0xff]  ;;  %v28_v12 = vld [vmem:[%s3022_s0 + $0x38] sm:$0xff]  ;;  %v151_v13 = vrot.slane %v150_v8, 4  ;;  %v158_v14 = vrot.slane %v157_v9, 4  ;;  %v1181_v17 = vld [vmem:[%s3023_s1] sm:$0xff]  ;;  %v165_v18 = vrot.slane %v164_v15, 4 }
   0x5   :  { %v171_v19 = vsel %vm149_vm0, %v24_v6, 0.0  ;;  %v178_v20 = vsel %vm149_vm0, %v25_v7, 0.0  ;;  %v185_v21 = vsel %vm149_vm0, %v26_v10, 0.0  ;;  %v192_v28 = vsel %vm149_vm0, %v27_v11, 0.0 }
   0x6   :  { %1482 = vmatpush.msra.mxu0 %v1182_v2  ;;  %1946 = vmatpush.msra.mxu2 %v1182_v2  ;;  %v152_v22 = vadd.f32 %v151_v13, %v150_v8  ;;  %v159_v23 = vadd.f32 %v158_v14, %v157_v9  ;;  %v172_v24 = vrot.slane %v171_v19, 4  ;;  %v179_v25 = vrot.slane %v178_v20, 4 }
   0x7   :  { %v166_v26 = vadd.f32 %v165_v18, %v164_v15  ;;  %v186_v27 = vrot.slane %v185_v21, 4  ;;  %v199_v29 = vsel %vm149_vm0, %v28_v12, 0.0  ;;  %v193_v36 = vrot.slane %v192_v28, 4  ;;  %v2128_v38 = vpop.eup %1958 }
   0x8   :  { %1483 = vmatpush.msra.mxu0 %v1181_v17  ;;  %1947 = vmatpush.msra.mxu2 %v1181_v17  ;;  %v153_v30 = vrot.slane %v152_v22, 2  ;;  %v160_v31 = vrot.slane %v159_v23, 2  ;;  %v173_v32 = vadd.f32 %v172_v24, %v171_v19  ;;  %v180_v33 = vadd.f32 %v179_v25, %v178_v20 }
   0x9   :  { %v167_v34 = vrot.slane %v166_v26, 2  ;;  %v187_v35 = vadd.f32 %v186_v27, %v185_v21  ;;  %v200_v37 = vrot.slane %v199_v29, 4  ;;  %v194_v45 = vadd.f32 %v193_v36, %v192_v28 }
   0xa   :  { %v154_v39 = vadd.f32 %v153_v30, %v152_v22  ;;  %v161_v40 = vadd.f32 %v160_v31, %v159_v23  ;;  %v174_v41 = vrot.slane %v173_v32, 2  ;;  %v181_v42 = vrot.slane %v180_v33, 2 }
   0xb   :  { %v168_v43 = vadd.f32 %v167_v34, %v166_v26  ;;  %v188_v44 = vrot.slane %v187_v35, 2  ;;  %v201_v46 = vadd.f32 %v200_v37, %v199_v29 }
   0xc   :  { %v155_v47 = vrot.slane %v154_v39, 1  ;;  %v162_v48 = vrot.slane %v161_v40, 1  ;;  %v175_v49 = vadd.f32 %v174_v41, %v173_v32  ;;  %v182_v50 = vadd.f32 %v181_v42, %v180_v33 }
   0xd   :  { %10 = vsyncpa [#allocation3], 0  ;;  %v169_v51 = vrot.slane %v168_v43, 1  ;;  %v189_v52 = vadd.f32 %v188_v44, %v187_v35  ;;  %v195_v53 = vrot.slane %v194_v45, 2  ;;  %v202_v54 = vrot.slane %v201_v46, 2  ;;  %v85_v61 = vld [vmem:[%s3022_s0 + $0x200] sm:$0xff] }
   0xe   :  { %v176_v55 = vrot.slane %v175_v49, 1  ;;  %v183_v56 = vrot.slane %v182_v50, 1  ;;  %v156_v57 = vadd.f32 %v155_v47, %v154_v39  ;;  %v86_v62 = vld [vmem:[%s3022_s0 + $0x208] sm:$0xff]  ;;  %v163_v63 = vadd.f32 %v162_v48, %v161_v40  ;;  %v87_v6 = vld [vmem:[%s3022_s0 + $0x210] sm:$0xff]  ;;  %v88_v7 = vld [vmem:[%s3022_s0 + $0x218] sm:$0xff]  ;;  %s1900_s9 = sshll.u32 %s3027_s5, 4  ;;  %s1901_s9 = int_to_ptr.hbm [resolvable:$true] %s1900_s9 }
   0xf   :  { %v190_v58 = vrot.slane %v189_v52, 1  ;;  %v196_v59 = vadd.f32 %v195_v53, %v194_v45  ;;  %v203_v60 = vadd.f32 %v202_v54, %v201_v46  ;;  %v170_v0 = vadd.f32 %v169_v51, %v168_v43  ;;  %v89_v8 = vld [vmem:[%s3022_s0 + $0x220] sm:$0xff]  ;;  %v90_v15 = vld [vmem:[%s3022_s0 + $0x228] sm:$0xff]  ;;  %v91_v16 = vld [vmem:[%s3022_s0 + $0x230] sm:$0xff]  ;;  %s2052_s10 = smov 128   ;;  %s2053_s11 = smov 8  }
  0x10   :  { %v177_v1 = vadd.f32 %v176_v55, %v175_v49  ;;  %v1047_v2 = vmul.f32 8.0, %v2128_v38  ;;  %vm1317_vm1 = vcmask 1041409   ;;  %v184_v3 = vadd.f32 %v183_v56, %v182_v50 }
  0x11   :  { %v197_v4 = vrot.slane %v196_v59, 1  ;;  %v204_v5 = vrot.slane %v203_v60, 1  ;;  %vm1051_vm2 = vweird.f32 %v2128_v38  ;;  %vm1319_vm3 = vcmask 1042434  }
  0x12   :  { %v191_v9 = vadd.f32 %v190_v58, %v189_v52  ;;  %v1048_v10 = vsub.f32 1.0, %v1047_v2  ;;  %vm1321_vm4 = vcmask 1043459   ;;  %v598_v11 = vsel %vm149_vm0, %v85_v61, 0.0 }
  0x13   :  { %v605_v12 = vsel %vm149_vm0, %v86_v62, 0.0  ;;  %v198_v13 = vadd.f32 %v197_v4, %v196_v59  ;;  %v205_v14 = vadd.f32 %v204_v5, %v203_v60  ;;  %vm1323_vm5 = vcmask 1044484   ;;  %v92_v60 = vld [vmem:[%s3022_s0 + $0x238] sm:$0xff] }
  0x14   :  { %v599_v17 = vrot.slane %v598_v11, 4  ;;  %v606_v18 = vrot.slane %v605_v12, 4  ;;  %v1049_v19 = vmul.f32 %v2128_v38, %v1048_v10  ;;  %vm1325_vm6 = vcmask 1045509  }
  0x15   :  { %v612_v20 = vsel %vm149_vm0, %v87_v6, 0.0  ;;  %v619_v21 = vsel %vm149_vm0, %v88_v7, 0.0  ;;  %v626_v22 = vsel %vm149_vm0, %v89_v8, 0.0  ;;  %vm1327_vm7 = vcmask 1046534  }
  0x16   :  { %v600_v23 = vadd.f32 %v599_v17, %v598_v11  ;;  %v607_v24 = vadd.f32 %v606_v18, %v605_v12  ;;  %v613_v25 = vrot.slane %v612_v20, 4  ;;  %v620_v26 = vrot.slane %v619_v21, 4  ;;  %v30_v17 = vld [vmem:[%s3022_s0 + $0x48] sm:$0xff] }
  0x17   :  { %v1050_v27 = vadd.f32 %v2128_v38, %v1049_v19  ;;  %vm1329_vm8 = vcmask 1047559   ;;  %v627_v28 = vrot.slane %v626_v22, 4  ;;  %v633_v29 = vsel %vm149_vm0, %v90_v15, 0.0 }
  0x18   :  { %v640_v30 = vsel %vm149_vm0, %v91_v16, 0.0  ;;  %v601_v31 = vrot.slane %v600_v23, 2  ;;  %v608_v32 = vrot.slane %v607_v24, 2  ;;  %v614_v33 = vadd.f32 %v613_v25, %v612_v20  ;;  %v29_v16 = vld [vmem:[%s3022_s0 + $0x40] sm:$0xff] }
  0x19   :  { %v621_v34 = vadd.f32 %v620_v26, %v619_v21  ;;  %v2165_v35 = vsel %vm1051_vm2, %v2128_v38, %v1050_v27  ;;  %v628_v36 = vadd.f32 %v627_v28, %v626_v22  ;;  %v634_v37 = vrot.slane %v633_v29, 4  ;;  %v31_v26 = vld [vmem:[%s3022_s0 + $0x50] sm:$0xff] }
  0x1a   :  { %v641_v39 = vrot.slane %v640_v30, 4  ;;  %v1053_v40 = vmul.f32 %v2165_v35, %v156_v57  ;;  %v1054_v41 = vmul.f32 %v2165_v35, %v163_v63  ;;  %v1055_v42 = vmul.f32 %v2165_v35, %v170_v0 }
  0x1b   :  { %v1056_v43 = vmul.f32 %v2165_v35, %v177_v1  ;;  %v1057_v44 = vmul.f32 %v2165_v35, %v184_v3  ;;  %v1058_v45 = vmul.f32 %v2165_v35, %v191_v9  ;;  %v1059_v46 = vmul.f32 %v2165_v35, %v198_v13 }
  0x1c   :  { %v1060_v38 = vmul.f32 %v2165_v35, %v205_v14  ;;  %v1318_v47 = vsel %vm1317_vm1, %v1054_v41, %v1053_v40  ;;  %v602_v48 = vadd.f32 %v601_v31, %v600_v23  ;;  %v609_v49 = vadd.f32 %v608_v32, %v607_v24 }
  0x1d   :  { %v615_v50 = vrot.slane %v614_v33, 2  ;;  %v1320_v51 = vsel %vm1319_vm3, %v1055_v42, %v1318_v47  ;;  %v622_v52 = vrot.slane %v621_v34, 2  ;;  %v629_v53 = vrot.slane %v628_v36, 2 }
  0x1e   :  { %v635_v54 = vadd.f32 %v634_v37, %v633_v29  ;;  %v1322_v55 = vsel %vm1321_vm4, %v1056_v43, %v1320_v51  ;;  %v603_v56 = vrot.slane %v602_v48, 1  ;;  %v610_v57 = vrot.slane %v609_v49, 1 }
  0x1f   :  { %v616_v58 = vadd.f32 %v615_v50, %v614_v33  ;;  %v1324_v59 = vsel %vm1323_vm5, %v1057_v44, %v1322_v55  ;;  %v623_v61 = vadd.f32 %v622_v52, %v621_v34  ;;  %v630_v62 = vadd.f32 %v629_v53, %v628_v36  ;;  %v32_v34 = vld [vmem:[%s3022_s0 + $0x58] sm:$0xff]  ;;  %v33_v44 = vld [vmem:[%s3022_s0 + $0x60] sm:$0xff] }
  0x20   :  { %v636_v63 = vrot.slane %v635_v54, 2  ;;  %v1326_v0 = vsel %vm1325_vm6, %v1058_v45, %v1324_v59  ;;  %v604_v1 = vadd.f32 %v603_v56, %v602_v48  ;;  %v611_v2 = vadd.f32 %v610_v57, %v609_v49  ;;  %v34_v45 = vld [vmem:[%s3022_s0 + $0x68] sm:$0xff] }
  0x21   :  { %v617_v3 = vrot.slane %v616_v58, 1  ;;  %v1328_v4 = vsel %vm1327_vm7, %v1059_v46, %v1326_v0  ;;  %v624_v5 = vrot.slane %v623_v61, 1  ;;  %v631_v6 = vrot.slane %v630_v62, 1 }
  0x22   :  { %v637_v7 = vadd.f32 %v636_v63, %v635_v54  ;;  %v1330_v8 = vsel %vm1329_vm8, %v1060_v38, %v1328_v4  ;;  %v642_v10 = vadd.f32 %v641_v39, %v640_v30  ;;  %v647_v11 = vsel %vm149_vm0, %v92_v60, 0.0  ;;  %v35_v60 = vld [vmem:[%s3022_s0 + $0x70] sm:$0xff] }
  0x23   :  { %v618_v9 = vadd.f32 %v617_v3, %v616_v58  ;;  %1912 = vmatmul.msk.f32.vlgmr.msra.gmra.mxu0 %vm149_vm0, %v1330_v8  ;;  %v625_v12 = vadd.f32 %v624_v5, %v623_v61  ;;  %v632_v13 = vadd.f32 %v631_v6, %v630_v62  ;;  %v648_v15 = vrot.slane %v647_v11, 4  ;;  %v36_v8 = vld [vmem:[%s3022_s0 + $0x78] sm:$0xff] }
  0x24   :  { %v638_v14 = vrot.slane %v637_v7, 1  ;;  %v643_v18 = vrot.slane %v642_v10, 2  ;;  %v1117_v19 = vmul.f32 %v2165_v35, %v604_v1  ;;  %v1118_v20 = vmul.f32 %v2165_v35, %v611_v2 }
  0x25   :  { %v1119_v21 = vmul.f32 %v2165_v35, %v618_v9  ;;  %v649_v23 = vadd.f32 %v648_v15, %v647_v11  ;;  %v1120_v24 = vmul.f32 %v2165_v35, %v625_v12  ;;  %v1121_v25 = vmul.f32 %v2165_v35, %v632_v13 }
  0x26   :  { %v639_v22 = vadd.f32 %v638_v14, %v637_v7  ;;  %v644_v27 = vadd.f32 %v643_v18, %v642_v10  ;;  %v1380_v28 = vsel %vm1317_vm1, %v1118_v20, %v1117_v19  ;;  %v206_v29 = vsel %vm149_vm0, %v29_v16, 0.0 }
  0x27   :  { %v213_v30 = vsel %vm149_vm0, %v30_v17, 0.0  ;;  %v650_v31 = vrot.slane %v649_v23, 2  ;;  %v1381_v33 = vsel %vm1319_vm3, %v1119_v21, %v1380_v28  ;;  %v207_v36 = vrot.slane %v206_v29, 4  ;;  %v93_v21 = vld [vmem:[%s3022_s0 + $0x240] sm:$0xff] }
  0x28   :  { %v1122_v32 = vmul.f32 %v2165_v35, %v639_v22  ;;  %v645_v37 = vrot.slane %v644_v27, 1  ;;  %v1382_v39 = vsel %vm1321_vm4, %v1120_v24, %v1381_v33  ;;  %v214_v40 = vrot.slane %v213_v30, 4 }
  0x29   :  { %v220_v41 = vsel %vm149_vm0, %v31_v26, 0.0  ;;  %v651_v42 = vadd.f32 %v650_v31, %v649_v23  ;;  %v1383_v43 = vsel %vm1323_vm5, %v1121_v25, %v1382_v39  ;;  %v208_v46 = vadd.f32 %v207_v36, %v206_v29 }
  0x2a   :  { %v221_v38 = vrot.slane %v220_v41, 4  ;;  %v646_v47 = vadd.f32 %v645_v37, %v644_v27  ;;  %v1384_v48 = vsel %vm1325_vm6, %v1122_v32, %v1383_v43  ;;  %v215_v49 = vadd.f32 %v214_v40, %v213_v30  ;;  %v94_v30 = vld [vmem:[%s3022_s0 + $0x248] sm:$0xff] }
  0x2b   :  { %v227_v50 = vsel %vm149_vm0, %v32_v34, 0.0  ;;  %v652_v51 = vrot.slane %v651_v42, 1  ;;  %v209_v52 = vrot.slane %v208_v46, 2  ;;  %v234_v57 = vsel %vm149_vm0, %v33_v44, 0.0 }
  0x2c   :  { %v222_v53 = vadd.f32 %v221_v38, %v220_v41  ;;  %v228_v54 = vrot.slane %v227_v50, 4  ;;  %v1123_v55 = vmul.f32 %v2165_v35, %v646_v47  ;;  %v216_v56 = vrot.slane %v215_v49, 2  ;;  %v95_v41 = vld [vmem:[%s3022_s0 + $0x250] sm:$0xff] }
  0x2d   :  { %v241_v58 = vsel %vm149_vm0, %v34_v45, 0.0  ;;  %v653_v59 = vadd.f32 %v652_v51, %v651_v42  ;;  %v210_v61 = vadd.f32 %v209_v52, %v208_v46  ;;  %v235_v2 = vrot.slane %v234_v57, 4 }
  0x2e   :  { %v223_v62 = vrot.slane %v222_v53, 2  ;;  %v229_v63 = vadd.f32 %v228_v54, %v227_v50  ;;  %v1385_v0 = vsel %vm1327_vm7, %v1123_v55, %v1384_v48  ;;  %v217_v1 = vadd.f32 %v216_v56, %v215_v49  ;;  %v96_v50 = vld [vmem:[%s3022_s0 + $0x258] sm:$0xff] }
  0x2f   :  { %v242_v3 = vrot.slane %v241_v58, 4  ;;  %v1124_v4 = vmul.f32 %v2165_v35, %v653_v59  ;;  %v211_v5 = vrot.slane %v210_v61, 1  ;;  %v236_v10 = vadd.f32 %v235_v2, %v234_v57  ;;  %v97_v59 = vld [vmem:[%s3022_s0 + $0x260] sm:$0xff] }
  0x30   :  { %v224_v6 = vadd.f32 %v223_v62, %v222_v53  ;;  %v230_v7 = vrot.slane %v229_v63, 2  ;;  %v218_v9 = vrot.slane %v217_v1, 1  ;;  %v248_v12 = vsel %vm149_vm0, %v35_v60, 0.0 }
  0x31   :  { %v243_v11 = vadd.f32 %v242_v3, %v241_v58  ;;  %v1386_v13 = vsel %vm1329_vm8, %v1124_v4, %v1385_v0  ;;  %v212_v14 = vadd.f32 %v211_v5, %v210_v61  ;;  %v237_v18 = vrot.slane %v236_v10, 2  ;;  %v98_v4 = vld [vmem:[%s3022_s0 + $0x268] sm:$0xff] }
  0x32   :  { %v225_v15 = vrot.slane %v224_v6, 1  ;;  %v231_v16 = vadd.f32 %v230_v7, %v229_v63  ;;  %1920 = vmatmul.msk.f32.vlgmr.msra.gmra.mxu2 %vm149_vm0, %v1386_v13  ;;  %v219_v17 = vadd.f32 %v218_v9, %v217_v1  ;;  %v249_v20 = vrot.slane %v248_v12, 4 }
  0x33   :  { %v244_v19 = vrot.slane %v243_v11, 2  ;;  %v255_v24 = vsel %vm149_vm0, %v36_v8, 0.0  ;;  %v1061_v25 = vmul.f32 %v2165_v35, %v212_v14  ;;  %v238_v26 = vadd.f32 %v237_v18, %v236_v10 }
  0x34   :  { %v226_v22 = vadd.f32 %v225_v15, %v224_v6  ;;  %v232_v23 = vrot.slane %v231_v16, 1  ;;  %v250_v28 = vadd.f32 %v249_v20, %v248_v12  ;;  %v256_v29 = vrot.slane %v255_v24, 4  ;;  %v99_v12 = vld [vmem:[%s3022_s0 + $0x270] sm:$0xff] }
  0x35   :  { %v245_v27 = vadd.f32 %v244_v19, %v243_v11  ;;  %v1062_v32 = vmul.f32 %v2165_v35, %v219_v17  ;;  %v654_v34 = vsel %vm149_vm0, %v93_v21, 0.0  ;;  %v239_v36 = vrot.slane %v238_v26, 1  ;;  %v100_v21 = vld [vmem:[%s3022_s0 + $0x278] sm:$0xff] }
  0x36   :  { %v233_v31 = vadd.f32 %v232_v23, %v231_v16  ;;  %v1063_v33 = vmul.f32 %v2165_v35, %v226_v22  ;;  %v251_v39 = vrot.slane %v250_v28, 2  ;;  %v257_v40 = vadd.f32 %v256_v29, %v255_v24 }
  0x37   :  { %v246_v37 = vrot.slane %v245_v27, 1  ;;  %v1331_v43 = vsel %vm1317_vm1, %v1062_v32, %v1061_v25  ;;  %v655_v44 = vrot.slane %v654_v34, 4  ;;  %v661_v45 = vsel %vm149_vm0, %v94_v30, 0.0 }
  0x38   :  { %v1064_v42 = vmul.f32 %v2165_v35, %v233_v31  ;;  %v240_v46 = vadd.f32 %v239_v36, %v238_v26  ;;  %v252_v47 = vadd.f32 %v251_v39, %v250_v28  ;;  %v258_v48 = vrot.slane %v257_v40, 2 }
  0x39   :  { %v247_v38 = vadd.f32 %v246_v37, %v245_v27  ;;  %v1332_v49 = vsel %vm1319_vm3, %v1063_v33, %v1331_v43  ;;  %v656_v51 = vadd.f32 %v655_v44, %v654_v34  ;;  %v662_v52 = vrot.slane %v661_v45, 4  ;;  %v37_v34 = vld [vmem:[%s3022_s0 + $0x80] sm:$0xff] }
  0x3a   :  { %v668_v53 = vsel %vm149_vm0, %v95_v41, 0.0  ;;  %v253_v54 = vrot.slane %v252_v47, 1  ;;  %v259_v55 = vadd.f32 %v258_v48, %v257_v40  ;;  %v1065_v56 = vmul.f32 %v2165_v35, %v240_v46 }
  0x3b   :  { %v1066_v57 = vmul.f32 %v2165_v35, %v247_v38  ;;  %v1333_v58 = vsel %vm1321_vm4, %v1064_v42, %v1332_v49  ;;  %v657_v60 = vrot.slane %v656_v51, 2  ;;  %v663_v61 = vadd.f32 %v662_v52, %v661_v45  ;;  %v38_v52 = vld [vmem:[%s3022_s0 + $0x88] sm:$0xff] }
  0x3c   :  { %v669_v62 = vrot.slane %v668_v53, 4  ;;  %v254_v63 = vadd.f32 %v253_v54, %v252_v47  ;;  %v260_v0 = vrot.slane %v259_v55, 1  ;;  %v1334_v1 = vsel %vm1323_vm5, %v1065_v56, %v1333_v58 }
  0x3d   :  { %v675_v2 = vsel %vm149_vm0, %v96_v50, 0.0  ;;  %v1335_v3 = vsel %vm1325_vm6, %v1066_v57, %v1334_v1  ;;  %v658_v5 = vadd.f32 %v657_v60, %v656_v51  ;;  %v664_v6 = vrot.slane %v663_v61, 2 }
  0x3e   :  { %v670_v7 = vadd.f32 %v669_v62, %v668_v53  ;;  %v261_v8 = vadd.f32 %v260_v0, %v259_v55  ;;  %v1067_v9 = vmul.f32 %v2165_v35, %v254_v63  ;;  %v676_v10 = vrot.slane %v675_v2, 4 }
  0x3f   :  { %v682_v11 = vsel %vm149_vm0, %v97_v59, 0.0  ;;  %v659_v13 = vrot.slane %v658_v5, 1  ;;  %v665_v14 = vadd.f32 %v664_v6, %v663_v61  ;;  %v689_v20 = vsel %vm149_vm0, %v98_v4, 0.0  ;;  %v39_v61 = vld [vmem:[%s3022_s0 + $0x90] sm:$0xff] }
  0x40   :  { %v671_v15 = vrot.slane %v670_v7, 2  ;;  %v683_v16 = vrot.slane %v682_v11, 4  ;;  %v1068_v17 = vmul.f32 %v2165_v35, %v261_v8  ;;  %v1336_v18 = vsel %vm1327_vm7, %v1067_v9, %v1335_v3 }
  0x41   :  { %v677_v19 = vadd.f32 %v676_v10, %v675_v2  ;;  %v660_v22 = vadd.f32 %v659_v13, %v658_v5  ;;  %v666_v23 = vrot.slane %v665_v14, 1  ;;  %v690_v28 = vrot.slane %v689_v20, 4  ;;  %v40_v5 = vld [vmem:[%s3022_s0 + $0x98] sm:$0xff] }
  0x42   :  { %v672_v24 = vadd.f32 %v671_v15, %v670_v7  ;;  %v684_v25 = vadd.f32 %v683_v16, %v682_v11  ;;  %v1337_v26 = vsel %vm1329_vm8, %v1068_v17, %v1336_v18  ;;  %v696_v29 = vsel %vm149_vm0, %v99_v12, 0.0 }
  0x43   :  { %v678_v27 = vrot.slane %v677_v19, 2  ;;  %1913 = vmatmul.msk.f32.gmra.mxu0 %vm149_vm0, %v1337_v26  ;;  %v667_v30 = vadd.f32 %v666_v23, %v665_v14  ;;  %v697_v33 = vrot.slane %v696_v29, 4  ;;  %v691_v37 = vadd.f32 %v690_v28, %v689_v20  ;;  %v41_v14 = vld [vmem:[%s3022_s0 + $0xa0] sm:$0xff] }
  0x44   :  { %v673_v31 = vrot.slane %v672_v24, 1  ;;  %v685_v32 = vrot.slane %v684_v25, 2  ;;  %v703_v39 = vsel %vm149_vm0, %v100_v21, 0.0  ;;  %v1125_v40 = vmul.f32 %v2165_v35, %v660_v22  ;;  %v42_v22 = vld [vmem:[%s3022_s0 + $0xa8] sm:$0xff] }
  0x45   :  { %v679_v36 = vadd.f32 %v678_v27, %v677_v19  ;;  %v698_v43 = vadd.f32 %v697_v33, %v696_v29  ;;  %v704_v44 = vrot.slane %v703_v39, 4  ;;  %v692_v46 = vrot.slane %v691_v37, 2 }
  0x46   :  { %v674_v41 = vadd.f32 %v673_v31, %v672_v24  ;;  %v686_v42 = vadd.f32 %v685_v32, %v684_v25  ;;  %v1126_v38 = vmul.f32 %v2165_v35, %v667_v30  ;;  %v262_v47 = vsel %vm149_vm0, %v37_v34, 0.0  ;;  %v43_v31 = vld [vmem:[%s3022_s0 + $0xb0] sm:$0xff]  ;;  %v44_v32 = vld [vmem:[%s3022_s0 + $0xb8] sm:$0xff] }
  0x47   :  { %v680_v45 = vrot.slane %v679_v36, 1  ;;  %v699_v49 = vrot.slane %v698_v43, 2  ;;  %v705_v50 = vadd.f32 %v704_v44, %v703_v39  ;;  %v693_v54 = vadd.f32 %v692_v46, %v691_v37 }
  0x48   :  { %v687_v48 = vrot.slane %v686_v42, 1  ;;  %v1127_v51 = vmul.f32 %v2165_v35, %v674_v41  ;;  %v1387_v55 = vsel %vm1317_vm1, %v1126_v38, %v1125_v40  ;;  %v263_v56 = vrot.slane %v262_v47, 4 }
  0x49   :  { %v681_v53 = vadd.f32 %v680_v45, %v679_v36  ;;  %v700_v58 = vadd.f32 %v699_v49, %v698_v43  ;;  %v706_v59 = vrot.slane %v705_v50, 2  ;;  %v694_v62 = vrot.slane %v693_v54, 1 }
  0x4a   :  { %v688_v57 = vadd.f32 %v687_v48, %v686_v42  ;;  %v1388_v60 = vsel %vm1319_vm3, %v1127_v51, %v1387_v55  ;;  %v264_v0 = vadd.f32 %v263_v56, %v262_v47  ;;  %v269_v1 = vsel %vm149_vm0, %v38_v52, 0.0  ;;  %v101_v52 = vld [vmem:[%s3022_s0 + $0x280] sm:$0xff] }
  0x4b   :  { %v1128_v63 = vmul.f32 %v2165_v35, %v681_v53  ;;  %v701_v2 = vrot.slane %v700_v58, 1  ;;  %v707_v3 = vadd.f32 %v706_v59, %v705_v50  ;;  %v270_v6 = vrot.slane %v269_v1, 4 }
  0x4c   :  { %v1129_v4 = vmul.f32 %v2165_v35, %v688_v57  ;;  %v695_v7 = vadd.f32 %v694_v62, %v693_v54  ;;  %v265_v9 = vrot.slane %v264_v0, 2  ;;  %v276_v10 = vsel %vm149_vm0, %v39_v61, 0.0 }
  0x4d   :  { %v1389_v8 = vsel %vm1321_vm4, %v1128_v63, %v1388_v60  ;;  %v702_v11 = vadd.f32 %v701_v2, %v700_v58  ;;  %v708_v12 = vrot.slane %v707_v3, 1  ;;  %v271_v15 = vadd.f32 %v270_v6, %v269_v1 }
  0x4e   :  { %v1390_v13 = vsel %vm1323_vm5, %v1129_v4, %v1389_v8  ;;  %v1130_v16 = vmul.f32 %v2165_v35, %v695_v7  ;;  %v266_v17 = vadd.f32 %v265_v9, %v264_v0  ;;  %v277_v18 = vrot.slane %v276_v10, 4  ;;  %v102_v0 = vld [vmem:[%s3022_s0 + $0x288] sm:$0xff] }
  0x4f   :  { %v283_v19 = vsel %vm149_vm0, %v40_v5, 0.0  ;;  %v709_v20 = vadd.f32 %v708_v12, %v707_v3  ;;  %v1131_v21 = vmul.f32 %v2165_v35, %v702_v11  ;;  %v272_v23 = vrot.slane %v271_v15, 2 }
  0x50   :  { %v284_v24 = vrot.slane %v283_v19, 4  ;;  %v1391_v25 = vsel %vm1325_vm6, %v1130_v16, %v1390_v13  ;;  %v267_v26 = vrot.slane %v266_v17, 1  ;;  %v278_v27 = vadd.f32 %v277_v18, %v276_v10  ;;  %v103_v13 = vld [vmem:[%s3022_s0 + $0x290] sm:$0xff] }
  0x51   :  { %v290_v28 = vsel %vm149_vm0, %v41_v14, 0.0  ;;  %v1132_v29 = vmul.f32 %v2165_v35, %v709_v20  ;;  %v1392_v30 = vsel %vm1327_vm7, %v1131_v21, %v1391_v25  ;;  %v273_v33 = vadd.f32 %v272_v23, %v271_v15 }
  0x52   :  { %v285_v34 = vadd.f32 %v284_v24, %v283_v19  ;;  %v268_v36 = vadd.f32 %v267_v26, %v266_v17  ;;  %v279_v37 = vrot.slane %v278_v27, 2  ;;  %v291_v39 = vrot.slane %v290_v28, 4 }
  0x53   :  { %v297_v40 = vsel %vm149_vm0, %v42_v22, 0.0  ;;  %v1393_v41 = vsel %vm1329_vm8, %v1132_v29, %v1392_v30  ;;  %v274_v42 = vrot.slane %v273_v33, 1  ;;  %v304_v38 = vsel %vm149_vm0, %v43_v31, 0.0  ;;  %v104_v22 = vld [vmem:[%s3022_s0 + $0x298] sm:$0xff]  ;;  %v105_v30 = vld [vmem:[%s3022_s0 + $0x2a0] sm:$0xff] }
  0x54   :  { %v286_v43 = vrot.slane %v285_v34, 2  ;;  %v298_v44 = vrot.slane %v297_v40, 4  ;;  %1921 = vmatmul.msk.f32.gmra.mxu2 %vm149_vm0, %v1393_v41  ;;  %v280_v45 = vadd.f32 %v279_v37, %v278_v27  ;;  %v292_v46 = vadd.f32 %v291_v39, %v290_v28  ;;  %v106_v41 = vld [vmem:[%s3022_s0 + $0x2a8] sm:$0xff] }
  0x55   :  { %v311_v47 = vsel %vm149_vm0, %v44_v32, 0.0  ;;  %v275_v48 = vadd.f32 %v274_v42, %v273_v33  ;;  %v305_v51 = vrot.slane %v304_v38, 4  ;;  %v1069_v56 = vmul.f32 %v2165_v35, %v268_v36 }
  0x56   :  { %v287_v49 = vadd.f32 %v286_v43, %v285_v34  ;;  %v299_v50 = vadd.f32 %v298_v44, %v297_v40  ;;  %v281_v53 = vrot.slane %v280_v45, 1  ;;  %v293_v54 = vrot.slane %v292_v46, 2 }
  0x57   :  { %v312_v55 = vrot.slane %v311_v47, 4  ;;  %v306_v59 = vadd.f32 %v305_v51, %v304_v38  ;;  %v1070_v60 = vmul.f32 %v2165_v35, %v275_v48  ;;  %v710_v1 = vsel %vm149_vm0, %v101_v52, 0.0  ;;  %v107_v48 = vld [vmem:[%s3022_s0 + $0x2b0] sm:$0xff] }
  0x58   :  { %v288_v57 = vrot.slane %v287_v49, 1  ;;  %v300_v58 = vrot.slane %v299_v50, 2  ;;  %v282_v61 = vadd.f32 %v281_v53, %v280_v45  ;;  %v294_v62 = vadd.f32 %v293_v54, %v292_v46 }
  0x59   :  { %v313_v63 = vadd.f32 %v312_v55, %v311_v47  ;;  %v307_v4 = vrot.slane %v306_v59, 2  ;;  %v1338_v5 = vsel %vm1317_vm1, %v1070_v60, %v1069_v56  ;;  %v711_v9 = vrot.slane %v710_v1, 4 }
  0x5a   :  { %v289_v2 = vadd.f32 %v288_v57, %v287_v49  ;;  %v301_v3 = vadd.f32 %v300_v58, %v299_v50  ;;  %v295_v6 = vrot.slane %v294_v62, 1  ;;  %v1071_v8 = vmul.f32 %v2165_v35, %v282_v61  ;;  %v108_v49 = vld [vmem:[%s3022_s0 + $0x2b8] sm:$0xff]  ;;  %v45_v61 = vld [vmem:[%s3022_s0 + $0xc0] sm:$0xff] }
  0x5b   :  { %v314_v7 = vrot.slane %v313_v63, 2  ;;  %v308_v11 = vadd.f32 %v307_v4, %v306_v59  ;;  %v717_v14 = vsel %vm149_vm0, %v102_v0, 0.0  ;;  %v712_v18 = vadd.f32 %v711_v9, %v710_v1 }
  0x5c   :  { %v302_v10 = vrot.slane %v301_v3, 1  ;;  %v1072_v12 = vmul.f32 %v2165_v35, %v289_v2  ;;  %v296_v15 = vadd.f32 %v295_v6, %v294_v62  ;;  %v1339_v17 = vsel %vm1319_vm3, %v1071_v8, %v1338_v5 }
  0x5d   :  { %v315_v16 = vadd.f32 %v314_v7, %v313_v63  ;;  %v309_v20 = vrot.slane %v308_v11, 1  ;;  %v718_v23 = vrot.slane %v717_v14, 4  ;;  %v713_v26 = vrot.slane %v712_v18, 2 }
  0x5e   :  { %v303_v19 = vadd.f32 %v302_v10, %v301_v3  ;;  %v1340_v21 = vsel %vm1321_vm4, %v1072_v12, %v1339_v17  ;;  %v1073_v25 = vmul.f32 %v2165_v35, %v296_v15  ;;  %v724_v27 = vsel %vm149_vm0, %v103_v13, 0.0  ;;  %v46_v17 = vld [vmem:[%s3022_s0 + $0xc8] sm:$0xff] }
  0x5f   :  { %v316_v24 = vrot.slane %v315_v16, 1  ;;  %v310_v28 = vadd.f32 %v309_v20, %v308_v11  ;;  %v719_v31 = vadd.f32 %v718_v23, %v717_v14  ;;  %v725_v32 = vrot.slane %v724_v27, 4 }
  0x60   :  { %v1074_v29 = vmul.f32 %v2165_v35, %v303_v19  ;;  %v1341_v34 = vsel %vm1323_vm5, %v1073_v25, %v1340_v21  ;;  %v714_v36 = vadd.f32 %v713_v26, %v712_v18  ;;  %v731_v37 = vsel %vm149_vm0, %v104_v22, 0.0  ;;  %v47_v26 = vld [vmem:[%s3022_s0 + $0xd0] sm:$0xff] }
  0x61   :  { %v317_v33 = vadd.f32 %v316_v24, %v315_v16  ;;  %v1075_v39 = vmul.f32 %v2165_v35, %v310_v28  ;;  %v720_v42 = vrot.slane %v719_v31, 2  ;;  %v726_v43 = vadd.f32 %v725_v32, %v724_v27 }
  0x62   :  { %v1342_v40 = vsel %vm1325_vm6, %v1074_v29, %v1341_v34  ;;  %v715_v45 = vrot.slane %v714_v36, 1  ;;  %v732_v46 = vrot.slane %v731_v37, 4  ;;  %v738_v38 = vsel %vm149_vm0, %v105_v30, 0.0 }
  0x63   :  { %v1076_v44 = vmul.f32 %v2165_v35, %v317_v33  ;;  %v1343_v47 = vsel %vm1327_vm7, %v1075_v39, %v1342_v40  ;;  %v721_v50 = vadd.f32 %v720_v42, %v719_v31  ;;  %v727_v51 = vrot.slane %v726_v43, 2  ;;  %v48_v40 = vld [vmem:[%s3022_s0 + $0xd8] sm:$0xff] }
  0x64   :  { %v739_v52 = vrot.slane %v738_v38, 4  ;;  %v716_v54 = vadd.f32 %v715_v45, %v714_v36  ;;  %v733_v55 = vadd.f32 %v732_v46, %v731_v37  ;;  %v745_v56 = vsel %vm149_vm0, %v106_v41, 0.0 }
  0x65   :  { %v1344_v53 = vsel %vm1329_vm8, %v1076_v44, %v1343_v47  ;;  %v722_v57 = vrot.slane %v721_v50, 1  ;;  %v728_v58 = vadd.f32 %v727_v51, %v726_v43  ;;  %v746_v60 = vrot.slane %v745_v56, 4 }
  0x66   :  { %1914 = vmatmul.msk.f32.gmra.mxu0 %vm149_vm0, %v1344_v53  ;;  %v740_v59 = vadd.f32 %v739_v52, %v738_v38  ;;  %v734_v62 = vrot.slane %v733_v55, 2  ;;  %v752_v63 = vsel %vm149_vm0, %v107_v48, 0.0  ;;  %v759_v0 = vsel %vm149_vm0, %v108_v49, 0.0  ;;  %v49_v48 = vld [vmem:[%s3022_s0 + $0xe0] sm:$0xff] }
  0x67   :  { %v1133_v1 = vmul.f32 %v2165_v35, %v716_v54  ;;  %v723_v2 = vadd.f32 %v722_v57, %v721_v50  ;;  %v729_v3 = vrot.slane %v728_v58, 1  ;;  %v747_v5 = vadd.f32 %v746_v60, %v745_v56  ;;  %v50_v56 = vld [vmem:[%s3022_s0 + $0xe8] sm:$0xff]  ;;  %v51_v57 = vld [vmem:[%s3022_s0 + $0xf0] sm:$0xff] }
  0x68   :  { %v741_v4 = vrot.slane %v740_v59, 2  ;;  %v735_v6 = vadd.f32 %v734_v62, %v733_v55  ;;  %v753_v7 = vrot.slane %v752_v63, 4  ;;  %v760_v8 = vrot.slane %v759_v0, 4 }
  0x69   :  { %v318_v9 = vsel %vm149_vm0, %v45_v61, 0.0  ;;  %v730_v10 = vadd.f32 %v729_v3, %v728_v58  ;;  %v748_v12 = vrot.slane %v747_v5, 2  ;;  %v1134_v13 = vmul.f32 %v2165_v35, %v723_v2  ;;  %v52_v58 = vld [vmem:[%s3022_s0 + $0xf8] sm:$0xff] }
  0x6a   :  { %v742_v11 = vadd.f32 %v741_v4, %v740_v59  ;;  %v736_v14 = vrot.slane %v735_v6, 1  ;;  %v754_v15 = vadd.f32 %v753_v7, %v752_v63  ;;  %v761_v16 = vadd.f32 %v760_v8, %v759_v0 }
  0x6b   :  { %v319_v18 = vrot.slane %v318_v9, 4  ;;  %v749_v20 = vadd.f32 %v748_v12, %v747_v5  ;;  %v1135_v21 = vmul.f32 %v2165_v35, %v730_v10  ;;  %v1394_v22 = vsel %vm1317_vm1, %v1134_v13, %v1133_v1 }
  0x6c   :  { %v743_v19 = vrot.slane %v742_v11, 1  ;;  %v737_v23 = vadd.f32 %v736_v14, %v735_v6  ;;  %v755_v24 = vrot.slane %v754_v15, 2  ;;  %v762_v25 = vrot.slane %v761_v16, 2 }
  0x6d   :  { %v320_v27 = vadd.f32 %v319_v18, %v318_v9  ;;  %v750_v29 = vrot.slane %v749_v20, 1  ;;  %v1395_v30 = vsel %vm1319_vm3, %v1135_v21, %v1394_v22  ;;  %v325_v31 = vsel %vm149_vm0, %v46_v17, 0.0  ;;  %v109_v18 = vld [vmem:[%s3022_s0 + $0x2c0] sm:$0xff] }
  0x6e   :  { %v744_v28 = vadd.f32 %v743_v19, %v742_v11  ;;  %v756_v32 = vadd.f32 %v755_v24, %v754_v15  ;;  %v763_v33 = vadd.f32 %v762_v25, %v761_v16  ;;  %v1136_v34 = vmul.f32 %v2165_v35, %v737_v23 }
  0x6f   :  { %v321_v36 = vrot.slane %v320_v27, 2  ;;  %v751_v37 = vadd.f32 %v750_v29, %v749_v20  ;;  %v326_v41 = vrot.slane %v325_v31, 4  ;;  %v332_v42 = vsel %vm149_vm0, %v47_v26, 0.0 }
  0x70   :  { %v1137_v39 = vmul.f32 %v2165_v35, %v744_v28  ;;  %v757_v43 = vrot.slane %v756_v32, 1  ;;  %v764_v44 = vrot.slane %v763_v33, 1  ;;  %v1396_v45 = vsel %vm1321_vm4, %v1136_v34, %v1395_v30 }
  0x71   :  { %v322_v46 = vadd.f32 %v321_v36, %v320_v27  ;;  %v1138_v38 = vmul.f32 %v2165_v35, %v751_v37  ;;  %v327_v49 = vadd.f32 %v326_v41, %v325_v31  ;;  %v333_v50 = vrot.slane %v332_v42, 4  ;;  %v110_v36 = vld [vmem:[%s3022_s0 + $0x2c8] sm:$0xff] }
  0x72   :  { %v1397_v47 = vsel %vm1323_vm5, %v1137_v39, %v1396_v45  ;;  %v758_v51 = vadd.f32 %v757_v43, %v756_v32  ;;  %v765_v52 = vadd.f32 %v764_v44, %v763_v33  ;;  %v339_v54 = vsel %vm149_vm0, %v48_v40, 0.0 }
  0x73   :  { %v323_v53 = vrot.slane %v322_v46, 1  ;;  %v1398_v55 = vsel %vm1325_vm6, %v1138_v38, %v1397_v47  ;;  %v328_v59 = vrot.slane %v327_v49, 2  ;;  %v334_v60 = vadd.f32 %v333_v50, %v332_v42 }
  0x74   :  { %v340_v61 = vrot.slane %v339_v54, 4  ;;  %v1139_v62 = vmul.f32 %v2165_v35, %v758_v51  ;;  %v1140_v63 = vmul.f32 %v2165_v35, %v765_v52  ;;  %v346_v1 = vsel %vm149_vm0, %v49_v48, 0.0 }
  0x75   :  { %v324_v0 = vadd.f32 %v323_v53, %v322_v46  ;;  %v329_v2 = vadd.f32 %v328_v59, %v327_v49  ;;  %v335_v3 = vrot.slane %v334_v60, 2  ;;  %v347_v5 = vrot.slane %v346_v1, 4  ;;  %v111_v46 = vld [vmem:[%s3022_s0 + $0x2d0] sm:$0xff] }
  0x76   :  { %v341_v4 = vadd.f32 %v340_v61, %v339_v54  ;;  %v1399_v6 = vsel %vm1327_vm7, %v1139_v62, %v1398_v55  ;;  %v353_v7 = vsel %vm149_vm0, %v50_v56, 0.0  ;;  %v360_v8 = vsel %vm149_vm0, %v51_v57, 0.0  ;;  %v112_v54 = vld [vmem:[%s3022_s0 + $0x2d8] sm:$0xff] }
  0x77   :  { %v367_v9 = vsel %vm149_vm0, %v52_v58, 0.0  ;;  %v1400_v10 = vsel %vm1329_vm8, %v1140_v63, %v1399_v6  ;;  %v330_v11 = vrot.slane %v329_v2, 1  ;;  %v336_v12 = vadd.f32 %v335_v3, %v334_v60  ;;  %v113_v63 = vld [vmem:[%s3022_s0 + $0x2e0] sm:$0xff] }
  0x78   :  { %v342_v13 = vrot.slane %v341_v4, 2  ;;  %1922 = vmatmul.msk.f32.gmra.mxu2 %vm149_vm0, %v1400_v10  ;;  %v348_v14 = vadd.f32 %v347_v5, %v346_v1  ;;  %v354_v15 = vrot.slane %v353_v7, 4  ;;  %v361_v16 = vrot.slane %v360_v8, 4  ;;  %v115_v1 = vld [vmem:[%s3022_s0 + $0x2f0] sm:$0xff] }
  0x79   :  { %v368_v17 = vrot.slane %v367_v9, 4  ;;  %v331_v19 = vadd.f32 %v330_v11, %v329_v2  ;;  %v337_v20 = vrot.slane %v336_v12, 1  ;;  %v1077_v22 = vmul.f32 %v2165_v35, %v324_v0  ;;  %v114_v0 = vld [vmem:[%s3022_s0 + $0x2e8] sm:$0xff] }
  0x7a   :  { %v343_v21 = vadd.f32 %v342_v13, %v341_v4  ;;  %v349_v23 = vrot.slane %v348_v14, 2  ;;  %v355_v24 = vadd.f32 %v354_v15, %v353_v7  ;;  %v362_v25 = vadd.f32 %v361_v16, %v360_v8  ;;  %v116_v15 = vld [vmem:[%s3022_s0 + $0x2f8] sm:$0xff] }
  0x7b   :  { %v369_v26 = vadd.f32 %v368_v17, %v367_v9  ;;  %v338_v27 = vadd.f32 %v337_v20, %v336_v12  ;;  %v1078_v29 = vmul.f32 %v2165_v35, %v331_v19  ;;  %v766_v30 = vsel %vm149_vm0, %v109_v18, 0.0 }
  0x7c   :  { %v344_v28 = vrot.slane %v343_v21, 1  ;;  %v350_v31 = vadd.f32 %v349_v23, %v348_v14  ;;  %v356_v32 = vrot.slane %v355_v24, 2  ;;  %v363_v33 = vrot.slane %v362_v25, 2 }
  0x7d   :  { %v370_v34 = vrot.slane %v369_v26, 2  ;;  %v1079_v39 = vmul.f32 %v2165_v35, %v338_v27  ;;  %v1345_v40 = vsel %vm1317_vm1, %v1078_v29, %v1077_v22  ;;  %v767_v41 = vrot.slane %v766_v30, 4 }
  0x7e   :  { %v345_v37 = vadd.f32 %v344_v28, %v343_v21  ;;  %v351_v42 = vrot.slane %v350_v31, 1  ;;  %v357_v43 = vadd.f32 %v356_v32, %v355_v24  ;;  %v364_v44 = vadd.f32 %v363_v33, %v362_v25 }
  0x7f   :  { %v371_v45 = vadd.f32 %v370_v34, %v369_v26  ;;  %v1346_v47 = vsel %vm1319_vm3, %v1079_v39, %v1345_v40  ;;  %v768_v48 = vadd.f32 %v767_v41, %v766_v30  ;;  %v773_v49 = vsel %vm149_vm0, %v110_v36, 0.0  ;;  %v53_v36 = vld [vmem:[%s3022_s0 + $0x100] sm:$0xff] }
  0x80   :  { %v1080_v38 = vmul.f32 %v2165_v35, %v345_v37  ;;  %v352_v50 = vadd.f32 %v351_v42, %v350_v31  ;;  %v358_v51 = vrot.slane %v357_v43, 1  ;;  %v365_v52 = vrot.slane %v364_v44, 1 }
  0x81   :  { %v372_v53 = vrot.slane %v371_v45, 1  ;;  %v769_v56 = vrot.slane %v768_v48, 2  ;;  %v774_v57 = vrot.slane %v773_v49, 4  ;;  %v780_v58 = vsel %vm149_vm0, %v111_v46, 0.0 }
  0x82   :  { %v1347_v55 = vsel %vm1321_vm4, %v1080_v38, %v1346_v47  ;;  %v359_v59 = vadd.f32 %v358_v51, %v357_v43  ;;  %v366_v60 = vadd.f32 %v365_v52, %v364_v44  ;;  %v1081_v62 = vmul.f32 %v2165_v35, %v352_v50 }
  0x83   :  { %v373_v61 = vadd.f32 %v372_v53, %v371_v45  ;;  %v770_v2 = vadd.f32 %v769_v56, %v768_v48  ;;  %v775_v3 = vadd.f32 %v774_v57, %v773_v49  ;;  %v781_v4 = vrot.slane %v780_v58, 4  ;;  %v54_v53 = vld [vmem:[%s3022_s0 + $0x108] sm:$0xff] }
  0x84   :  { %v787_v5 = vsel %vm149_vm0, %v112_v54, 0.0  ;;  %v1082_v6 = vmul.f32 %v2165_v35, %v359_v59  ;;  %v1083_v7 = vmul.f32 %v2165_v35, %v366_v60  ;;  %v1348_v9 = vsel %vm1323_vm5, %v1081_v62, %v1347_v55  ;;  %v55_v62 = vld [vmem:[%s3022_s0 + $0x110] sm:$0xff] }
  0x85   :  { %v1084_v8 = vmul.f32 %v2165_v35, %v373_v61  ;;  %v771_v10 = vrot.slane %v770_v2, 1  ;;  %v776_v11 = vrot.slane %v775_v3, 2  ;;  %v782_v12 = vadd.f32 %v781_v4, %v780_v58 }
  0x86   :  { %v788_v13 = vrot.slane %v787_v5, 4  ;;  %v1349_v14 = vsel %vm1325_vm6, %v1082_v6, %v1348_v9  ;;  %v794_v16 = vsel %vm149_vm0, %v113_v63, 0.0  ;;  %v801_v17 = vsel %vm149_vm0, %v114_v0, 0.0  ;;  %v57_v9 = vld [vmem:[%s3022_s0 + $0x120] sm:$0xff] }
  0x87   :  { %v808_v18 = vsel %vm149_vm0, %v115_v1, 0.0  ;;  %v1350_v19 = vsel %vm1327_vm7, %v1083_v7, %v1349_v14  ;;  %v772_v20 = vadd.f32 %v771_v10, %v770_v2  ;;  %v777_v21 = vadd.f32 %v776_v11, %v775_v3 }
  0x88   :  { %v783_v22 = vrot.slane %v782_v12, 2  ;;  %v1351_v23 = vsel %vm1329_vm8, %v1084_v8, %v1350_v19  ;;  %v789_v24 = vadd.f32 %v788_v13, %v787_v5  ;;  %v795_v25 = vrot.slane %v794_v16, 4  ;;  %v56_v8 = vld [vmem:[%s3022_s0 + $0x118] sm:$0xff] }
  0x89   :  { %v802_v26 = vrot.slane %v801_v17, 4  ;;  %1915 = vmatmul.msk.f32.gmra.mxu0 %vm149_vm0, %v1351_v23  ;;  %v778_v27 = vrot.slane %v777_v21, 1  ;;  %v809_v29 = vrot.slane %v808_v18, 4  ;;  %v815_v30 = vsel %vm149_vm0, %v116_v15, 0.0 }
  0x8a   :  { %v784_v28 = vadd.f32 %v783_v22, %v782_v12  ;;  %v790_v31 = vrot.slane %v789_v24, 2  ;;  %v796_v32 = vadd.f32 %v795_v25, %v794_v16  ;;  %v816_v34 = vrot.slane %v815_v30, 4 }
  0x8b   :  { %v803_v33 = vadd.f32 %v802_v26, %v801_v17  ;;  %v779_v37 = vadd.f32 %v778_v27, %v777_v21  ;;  %v810_v40 = vadd.f32 %v809_v29, %v808_v18  ;;  %v1141_v41 = vmul.f32 %v2165_v35, %v772_v20  ;;  %v58_v18 = vld [vmem:[%s3022_s0 + $0x128] sm:$0xff]  ;;  %v59_v27 = vld [vmem:[%s3022_s0 + $0x130] sm:$0xff] }
  0x8c   :  { %v785_v39 = vrot.slane %v784_v28, 1  ;;  %v791_v42 = vadd.f32 %v790_v31, %v789_v24  ;;  %v797_v43 = vrot.slane %v796_v32, 2  ;;  %v817_v45 = vadd.f32 %v816_v34, %v815_v30 }
  0x8d   :  { %v804_v44 = vrot.slane %v803_v33, 2  ;;  %v811_v38 = vrot.slane %v810_v40, 2  ;;  %v1142_v47 = vmul.f32 %v2165_v35, %v779_v37  ;;  %v374_v48 = vsel %vm149_vm0, %v53_v36, 0.0 }
  0x8e   :  { %v786_v46 = vadd.f32 %v785_v39, %v784_v28  ;;  %v792_v49 = vrot.slane %v791_v42, 1  ;;  %v798_v50 = vadd.f32 %v797_v43, %v796_v32  ;;  %v818_v52 = vrot.slane %v817_v45, 2  ;;  %v60_v32 = vld [vmem:[%s3022_s0 + $0x138] sm:$0xff] }
  0x8f   :  { %v805_v51 = vadd.f32 %v804_v44, %v803_v33  ;;  %v812_v54 = vadd.f32 %v811_v38, %v810_v40  ;;  %v1401_v56 = vsel %vm1317_vm1, %v1142_v47, %v1141_v41  ;;  %v375_v57 = vrot.slane %v374_v48, 4 }
  0x90   :  { %v1143_v55 = vmul.f32 %v2165_v35, %v786_v46  ;;  %v793_v58 = vadd.f32 %v792_v49, %v791_v42  ;;  %v799_v59 = vrot.slane %v798_v50, 1  ;;  %v819_v61 = vadd.f32 %v818_v52, %v817_v45 }
  0x91   :  { %v806_v60 = vrot.slane %v805_v51, 1  ;;  %v813_v63 = vrot.slane %v812_v54, 1  ;;  %v376_v1 = vadd.f32 %v375_v57, %v374_v48  ;;  %v381_v2 = vsel %vm149_vm0, %v54_v53, 0.0  ;;  %v117_v53 = vld [vmem:[%s3022_s0 + $0x300] sm:$0xff] }
  0x92   :  { %v1402_v0 = vsel %vm1319_vm3, %v1143_v55, %v1401_v56  ;;  %v800_v3 = vadd.f32 %v799_v59, %v798_v50  ;;  %v820_v5 = vrot.slane %v819_v61, 1  ;;  %v1144_v6 = vmul.f32 %v2165_v35, %v793_v58 }
  0x93   :  { %v807_v4 = vadd.f32 %v806_v60, %v805_v51  ;;  %v814_v7 = vadd.f32 %v813_v63, %v812_v54  ;;  %v377_v10 = vrot.slane %v376_v1, 2  ;;  %v382_v11 = vrot.slane %v381_v2, 4 }
  0x94   :  { %v388_v12 = vsel %vm149_vm0, %v55_v62, 0.0  ;;  %v821_v13 = vadd.f32 %v820_v5, %v819_v61  ;;  %v1145_v14 = vmul.f32 %v2165_v35, %v800_v3  ;;  %v1403_v16 = vsel %vm1321_vm4, %v1144_v6, %v1402_v0  ;;  %v118_v6 = vld [vmem:[%s3022_s0 + $0x308] sm:$0xff] }
  0x95   :  { %v1146_v15 = vmul.f32 %v2165_v35, %v807_v4  ;;  %v1147_v17 = vmul.f32 %v2165_v35, %v814_v7  ;;  %v378_v19 = vadd.f32 %v377_v10, %v376_v1  ;;  %v383_v20 = vadd.f32 %v382_v11, %v381_v2 }
  0x96   :  { %v389_v21 = vrot.slane %v388_v12, 4  ;;  %v1148_v22 = vmul.f32 %v2165_v35, %v821_v13  ;;  %v1404_v23 = vsel %vm1323_vm5, %v1145_v14, %v1403_v16  ;;  %v395_v24 = vsel %vm149_vm0, %v56_v8, 0.0 }
  0x97   :  { %v402_v25 = vsel %vm149_vm0, %v57_v9, 0.0  ;;  %v1405_v26 = vsel %vm1325_vm6, %v1146_v15, %v1404_v23  ;;  %v379_v28 = vrot.slane %v378_v19, 1  ;;  %v384_v29 = vrot.slane %v383_v20, 2  ;;  %v119_v15 = vld [vmem:[%s3022_s0 + $0x310] sm:$0xff] }
  0x98   :  { %v390_v30 = vadd.f32 %v389_v21, %v388_v12  ;;  %v1406_v31 = vsel %vm1327_vm7, %v1147_v17, %v1405_v26  ;;  %v396_v33 = vrot.slane %v395_v24, 4  ;;  %v403_v34 = vrot.slane %v402_v25, 4 }
  0x99   :  { %v409_v36 = vsel %vm149_vm0, %v58_v18, 0.0  ;;  %v1407_v37 = vsel %vm1329_vm8, %v1148_v22, %v1406_v31  ;;  %v380_v39 = vadd.f32 %v379_v28, %v378_v19  ;;  %v385_v40 = vadd.f32 %v384_v29, %v383_v20 }
  0x9a   :  { %v391_v41 = vrot.slane %v390_v30, 2  ;;  %1923 = vmatmul.msk.f32.gmra.mxu2 %vm149_vm0, %v1407_v37  ;;  %v397_v42 = vadd.f32 %v396_v33, %v395_v24  ;;  %v404_v43 = vadd.f32 %v403_v34, %v402_v25  ;;  %v410_v44 = vrot.slane %v409_v36, 4  ;;  %v120_v25 = vld [vmem:[%s3022_s0 + $0x318] sm:$0xff]  ;;  %v122_v37 = vld [vmem:[%s3022_s0 + $0x328] sm:$0xff] }
  0x9b   :  { %v416_v45 = vsel %vm149_vm0, %v59_v27, 0.0  ;;  %v386_v46 = vrot.slane %v385_v40, 1  ;;  %v423_v48 = vsel %vm149_vm0, %v60_v32, 0.0  ;;  %v1085_v57 = vmul.f32 %v2165_v35, %v380_v39 }
  0x9c   :  { %v392_v38 = vadd.f32 %v391_v41, %v390_v30  ;;  %v417_v47 = vrot.slane %v416_v45, 4  ;;  %v398_v49 = vrot.slane %v397_v42, 2  ;;  %v405_v50 = vrot.slane %v404_v43, 2 }
  0x9d   :  { %v411_v51 = vadd.f32 %v410_v44, %v409_v36  ;;  %v424_v52 = vrot.slane %v423_v48, 4  ;;  %v387_v54 = vadd.f32 %v386_v46, %v385_v40  ;;  %v822_v1 = vsel %vm149_vm0, %v117_v53, 0.0  ;;  %v121_v36 = vld [vmem:[%s3022_s0 + $0x320] sm:$0xff]  ;;  %v123_v46 = vld [vmem:[%s3022_s0 + $0x330] sm:$0xff] }
  0x9e   :  { %v393_v55 = vrot.slane %v392_v38, 1  ;;  %v418_v56 = vadd.f32 %v417_v47, %v416_v45  ;;  %v399_v58 = vadd.f32 %v398_v49, %v397_v42  ;;  %v406_v59 = vadd.f32 %v405_v50, %v404_v43 }
  0x9f   :  { %v412_v60 = vrot.slane %v411_v51, 2  ;;  %v425_v61 = vadd.f32 %v424_v52, %v423_v48  ;;  %v1086_v0 = vmul.f32 %v2165_v35, %v387_v54  ;;  %v823_v10 = vrot.slane %v822_v1, 4 }
  0xa0   :  { %v394_v62 = vadd.f32 %v393_v55, %v392_v38  ;;  %v419_v63 = vrot.slane %v418_v56, 2  ;;  %v400_v2 = vrot.slane %v399_v58, 1  ;;  %v407_v3 = vrot.slane %v406_v59, 1  ;;  %v124_v38 = vld [vmem:[%s3022_s0 + $0x338] sm:$0xff] }
  0xa1   :  { %v413_v4 = vadd.f32 %v412_v60, %v411_v51  ;;  %v426_v5 = vrot.slane %v425_v61, 2  ;;  %v1352_v9 = vsel %vm1317_vm1, %v1086_v0, %v1085_v57  ;;  %v824_v18 = vadd.f32 %v823_v10, %v822_v1 }
  0xa2   :  { %v420_v7 = vadd.f32 %v419_v63, %v418_v56  ;;  %v1087_v8 = vmul.f32 %v2165_v35, %v394_v62  ;;  %v401_v11 = vadd.f32 %v400_v2, %v399_v58  ;;  %v408_v12 = vadd.f32 %v407_v3, %v406_v59  ;;  %v61_v2 = vld [vmem:[%s3022_s0 + $0x140] sm:$0xff] }
  0xa3   :  { %v414_v13 = vrot.slane %v413_v4, 1  ;;  %v427_v14 = vadd.f32 %v426_v5, %v425_v61  ;;  %v829_v19 = vsel %vm149_vm0, %v118_v6, 0.0  ;;  %v825_v26 = vrot.slane %v824_v18, 2 }
  0xa4   :  { %v421_v16 = vrot.slane %v420_v7, 1  ;;  %v1353_v17 = vsel %vm1319_vm3, %v1087_v8, %v1352_v9  ;;  %v1088_v22 = vmul.f32 %v2165_v35, %v401_v11  ;;  %v1089_v23 = vmul.f32 %v2165_v35, %v408_v12 }
  0xa5   :  { %v415_v20 = vadd.f32 %v414_v13, %v413_v4  ;;  %v428_v21 = vrot.slane %v427_v14, 1  ;;  %v830_v27 = vrot.slane %v829_v19, 4  ;;  %v836_v28 = vsel %vm149_vm0, %v119_v15, 0.0 }
  0xa6   :  { %v422_v24 = vadd.f32 %v421_v16, %v420_v7  ;;  %v1354_v31 = vsel %vm1321_vm4, %v1088_v22, %v1353_v17  ;;  %v837_v32 = vrot.slane %v836_v28, 4  ;;  %v826_v39 = vadd.f32 %v825_v26, %v824_v18  ;;  %v62_v22 = vld [vmem:[%s3022_s0 + $0x148] sm:$0xff] }
  0xa7   :  { %v429_v29 = vadd.f32 %v428_v21, %v427_v14  ;;  %v1090_v30 = vmul.f32 %v2165_v35, %v415_v20  ;;  %v1355_v34 = vsel %vm1323_vm5, %v1089_v23, %v1354_v31  ;;  %v831_v40 = vadd.f32 %v830_v27, %v829_v19  ;;  %v63_v31 = vld [vmem:[%s3022_s0 + $0x150] sm:$0xff] }
  0xa8   :  { %v1091_v33 = vmul.f32 %v2165_v35, %v422_v24  ;;  %v838_v43 = vadd.f32 %v837_v32, %v836_v28  ;;  %v843_v44 = vsel %vm149_vm0, %v120_v25, 0.0  ;;  %v827_v47 = vrot.slane %v826_v39, 1 }
  0xa9   :  { %v1092_v41 = vmul.f32 %v2165_v35, %v429_v29  ;;  %v1356_v42 = vsel %vm1325_vm6, %v1090_v30, %v1355_v34  ;;  %v832_v48 = vrot.slane %v831_v40, 2  ;;  %v844_v49 = vrot.slane %v843_v44, 4 }
  0xaa   :  { %v1357_v45 = vsel %vm1327_vm7, %v1091_v33, %v1356_v42  ;;  %v839_v51 = vrot.slane %v838_v43, 2  ;;  %v850_v52 = vsel %vm149_vm0, %v121_v36, 0.0  ;;  %v857_v53 = vsel %vm149_vm0, %v122_v37, 0.0 }
  0xab   :  { %v1358_v50 = vsel %vm1329_vm8, %v1092_v41, %v1357_v45  ;;  %v828_v54 = vadd.f32 %v827_v47, %v826_v39  ;;  %v833_v55 = vadd.f32 %v832_v48, %v831_v40  ;;  %v845_v56 = vadd.f32 %v844_v49, %v843_v44  ;;  %v64_v41 = vld [vmem:[%s3022_s0 + $0x158] sm:$0xff]  ;;  %v65_v49 = vld [vmem:[%s3022_s0 + $0x160] sm:$0xff] }
  0xac   :  { %1916 = vmatmul.msk.f32.gmra.mxu0 %vm149_vm0, %v1358_v50  ;;  %v851_v57 = vrot.slane %v850_v52, 4  ;;  %v840_v58 = vadd.f32 %v839_v51, %v838_v43  ;;  %v858_v59 = vrot.slane %v857_v53, 4  ;;  %v864_v60 = vsel %vm149_vm0, %v123_v46, 0.0 }
  0xad   :  { %v871_v61 = vsel %vm149_vm0, %v124_v38, 0.0  ;;  %v834_v62 = vrot.slane %v833_v55, 1  ;;  %v846_v63 = vrot.slane %v845_v56, 2  ;;  %v865_v1 = vrot.slane %v864_v60, 4 }
  0xae   :  { %v852_v0 = vadd.f32 %v851_v57, %v850_v52  ;;  %v841_v3 = vrot.slane %v840_v58, 1  ;;  %v859_v4 = vadd.f32 %v858_v59, %v857_v53  ;;  %v872_v5 = vrot.slane %v871_v61, 4  ;;  %v67_v59 = vld [vmem:[%s3022_s0 + $0x170] sm:$0xff] }
  0xaf   :  { %v1149_v6 = vmul.f32 %v2165_v35, %v828_v54  ;;  %v835_v7 = vadd.f32 %v834_v62, %v833_v55  ;;  %v847_v8 = vadd.f32 %v846_v63, %v845_v56  ;;  %v866_v10 = vadd.f32 %v865_v1, %v864_v60 }
  0xb0   :  { %v853_v9 = vrot.slane %v852_v0, 2  ;;  %v842_v11 = vadd.f32 %v841_v3, %v840_v58  ;;  %v860_v12 = vrot.slane %v859_v4, 2  ;;  %v873_v13 = vadd.f32 %v872_v5, %v871_v61  ;;  %v66_v58 = vld [vmem:[%s3022_s0 + $0x168] sm:$0xff]  ;;  %v68_v3 = vld [vmem:[%s3022_s0 + $0x178] sm:$0xff] }
  0xb1   :  { %v430_v14 = vsel %vm149_vm0, %v61_v2, 0.0  ;;  %v848_v15 = vrot.slane %v847_v8, 1  ;;  %v867_v17 = vrot.slane %v866_v10, 2  ;;  %v1150_v18 = vmul.f32 %v2165_v35, %v835_v7 }
  0xb2   :  { %v854_v16 = vadd.f32 %v853_v9, %v852_v0  ;;  %v861_v19 = vadd.f32 %v860_v12, %v859_v4  ;;  %v874_v20 = vrot.slane %v873_v13, 2  ;;  %v1151_v21 = vmul.f32 %v2165_v35, %v842_v11 }
  0xb3   :  { %v431_v23 = vrot.slane %v430_v14, 4  ;;  %v849_v24 = vadd.f32 %v848_v15, %v847_v8  ;;  %v868_v26 = vadd.f32 %v867_v17, %v866_v10  ;;  %v1408_v27 = vsel %vm1317_vm1, %v1150_v18, %v1149_v6  ;;  %v125_v15 = vld [vmem:[%s3022_s0 + $0x340] sm:$0xff] }
  0xb4   :  { %v855_v25 = vrot.slane %v854_v16, 1  ;;  %v862_v28 = vrot.slane %v861_v19, 1  ;;  %v875_v29 = vadd.f32 %v874_v20, %v873_v13  ;;  %v1409_v30 = vsel %vm1319_vm3, %v1151_v21, %v1408_v27 }
  0xb5   :  { %v432_v32 = vadd.f32 %v431_v23, %v430_v14  ;;  %v869_v34 = vrot.slane %v868_v26, 1  ;;  %v1152_v36 = vmul.f32 %v2165_v35, %v849_v24  ;;  %v437_v37 = vsel %vm149_vm0, %v62_v22, 0.0 }
  0xb6   :  { %v856_v33 = vadd.f32 %v855_v25, %v854_v16  ;;  %v863_v39 = vadd.f32 %v862_v28, %v861_v19  ;;  %v876_v40 = vrot.slane %v875_v29, 1  ;;  %v438_v43 = vrot.slane %v437_v37, 4 }
  0xb7   :  { %v433_v42 = vrot.slane %v432_v32, 2  ;;  %v870_v44 = vadd.f32 %v869_v34, %v868_v26  ;;  %v1410_v46 = vsel %vm1321_vm4, %v1152_v36, %v1409_v30  ;;  %v444_v38 = vsel %vm149_vm0, %v63_v31, 0.0  ;;  %v126_v36 = vld [vmem:[%s3022_s0 + $0x348] sm:$0xff] }
  0xb8   :  { %v1153_v45 = vmul.f32 %v2165_v35, %v856_v33  ;;  %v877_v47 = vadd.f32 %v876_v40, %v875_v29  ;;  %v1154_v48 = vmul.f32 %v2165_v35, %v863_v39  ;;  %v439_v51 = vadd.f32 %v438_v43, %v437_v37 }
  0xb9   :  { %v434_v50 = vadd.f32 %v433_v42, %v432_v32  ;;  %v1155_v52 = vmul.f32 %v2165_v35, %v870_v44  ;;  %v445_v54 = vrot.slane %v444_v38, 4  ;;  %v451_v55 = vsel %vm149_vm0, %v64_v41, 0.0 }
  0xba   :  { %v1411_v53 = vsel %vm1323_vm5, %v1153_v45, %v1410_v46  ;;  %v1156_v56 = vmul.f32 %v2165_v35, %v877_v47  ;;  %v440_v61 = vrot.slane %v439_v51, 2  ;;  %v452_v0 = vrot.slane %v451_v55, 4 }
  0xbb   :  { %v1412_v57 = vsel %vm1325_vm6, %v1154_v48, %v1411_v53  ;;  %v435_v60 = vrot.slane %v434_v50, 1  ;;  %v446_v63 = vadd.f32 %v445_v54, %v444_v38  ;;  %v458_v1 = vsel %vm149_vm0, %v65_v49, 0.0  ;;  %v127_v49 = vld [vmem:[%s3022_s0 + $0x350] sm:$0xff] }
  0xbc   :  { %v1413_v62 = vsel %vm1327_vm7, %v1155_v52, %v1412_v57  ;;  %v441_v5 = vadd.f32 %v440_v61, %v439_v51  ;;  %v459_v6 = vrot.slane %v458_v1, 4  ;;  %v453_v8 = vadd.f32 %v452_v0, %v451_v55 }
  0xbd   :  { %v1414_v2 = vsel %vm1329_vm8, %v1156_v56, %v1413_v62  ;;  %v436_v4 = vadd.f32 %v435_v60, %v434_v50  ;;  %v447_v7 = vrot.slane %v446_v63, 2  ;;  %v465_v9 = vsel %vm149_vm0, %v66_v58, 0.0  ;;  %v128_v58 = vld [vmem:[%s3022_s0 + $0x358] sm:$0xff]  ;;  %v129_v62 = vld [vmem:[%s3022_s0 + $0x360] sm:$0xff] }
  0xbe   :  { %1924 = vmatmul.msk.f32.gmra.mxu2 %vm149_vm0, %v1414_v2  ;;  %v472_v10 = vsel %vm149_vm0, %v67_v59, 0.0  ;;  %v442_v11 = vrot.slane %v441_v5, 1  ;;  %v460_v12 = vadd.f32 %v459_v6, %v458_v1  ;;  %v466_v13 = vrot.slane %v465_v9, 4  ;;  %v130_v6 = vld [vmem:[%s3022_s0 + $0x368] sm:$0xff] }
  0xbf   :  { %v473_v14 = vrot.slane %v472_v10, 4  ;;  %v448_v16 = vadd.f32 %v447_v7, %v446_v63  ;;  %v454_v17 = vrot.slane %v453_v8, 2  ;;  %v479_v18 = vsel %vm149_vm0, %v68_v3, 0.0 }
  0xc0   :  { %v1093_v19 = vmul.f32 %v2165_v35, %v436_v4  ;;  %v443_v20 = vadd.f32 %v442_v11, %v441_v5  ;;  %v461_v21 = vrot.slane %v460_v12, 2  ;;  %v467_v22 = vadd.f32 %v466_v13, %v465_v9  ;;  %v131_v11 = vld [vmem:[%s3022_s0 + $0x370] sm:$0xff] }
  0xc1   :  { %v474_v23 = vadd.f32 %v473_v14, %v472_v10  ;;  %v449_v24 = vrot.slane %v448_v16, 1  ;;  %v455_v25 = vadd.f32 %v454_v17, %v453_v8  ;;  %v480_v26 = vrot.slane %v479_v18, 4 }
  0xc2   :  { %v878_v27 = vsel %vm149_vm0, %v125_v15, 0.0  ;;  %v462_v28 = vadd.f32 %v461_v21, %v460_v12  ;;  %v468_v29 = vrot.slane %v467_v22, 2  ;;  %v1094_v31 = vmul.f32 %v2165_v35, %v443_v20 }
  0xc3   :  { %v475_v30 = vrot.slane %v474_v23, 2  ;;  %v450_v32 = vadd.f32 %v449_v24, %v448_v16  ;;  %v456_v33 = vrot.slane %v455_v25, 1  ;;  %v481_v34 = vadd.f32 %v480_v26, %v479_v18 }
  0xc4   :  { %v879_v37 = vrot.slane %v878_v27, 4  ;;  %v463_v39 = vrot.slane %v462_v28, 1  ;;  %v469_v40 = vadd.f32 %v468_v29, %v467_v22  ;;  %v1359_v42 = vsel %vm1317_vm1, %v1094_v31, %v1093_v19  ;;  %v132_v19 = vld [vmem:[%s3022_s0 + $0x378] sm:$0xff] }
  0xc5   :  { %v476_v41 = vadd.f32 %v475_v30, %v474_v23  ;;  %v457_v43 = vadd.f32 %v456_v33, %v455_v25  ;;  %v482_v44 = vrot.slane %v481_v34, 2  ;;  %v1095_v45 = vmul.f32 %v2165_v35, %v450_v32  ;;  %v69_v32 = vld [vmem:[%s3022_s0 + $0x180] sm:$0xff] }
  0xc6   :  { %v880_v46 = vadd.f32 %v879_v37, %v878_v27  ;;  %v464_v38 = vadd.f32 %v463_v39, %v462_v28  ;;  %v470_v47 = vrot.slane %v469_v40, 1  ;;  %v885_v50 = vsel %vm149_vm0, %v126_v36, 0.0 }
  0xc7   :  { %v477_v48 = vrot.slane %v476_v41, 1  ;;  %v483_v51 = vadd.f32 %v482_v44, %v481_v34  ;;  %v1096_v52 = vmul.f32 %v2165_v35, %v457_v43  ;;  %v1360_v53 = vsel %vm1319_vm3, %v1095_v45, %v1359_v42 }
  0xc8   :  { %v881_v54 = vrot.slane %v880_v46, 2  ;;  %v471_v55 = vadd.f32 %v470_v47, %v469_v40  ;;  %v1097_v57 = vmul.f32 %v2165_v35, %v464_v38  ;;  %v886_v59 = vrot.slane %v885_v50, 4 }
  0xc9   :  { %v478_v56 = vadd.f32 %v477_v48, %v476_v41  ;;  %v484_v60 = vrot.slane %v483_v51, 1  ;;  %v1361_v61 = vsel %vm1321_vm4, %v1096_v52, %v1360_v53  ;;  %v892_v0 = vsel %vm149_vm0, %v127_v49, 0.0  ;;  %v70_v53 = vld [vmem:[%s3022_s0 + $0x188] sm:$0xff] }
  0xca   :  { %v882_v63 = vadd.f32 %v881_v54, %v880_v46  ;;  %v1098_v1 = vmul.f32 %v2165_v35, %v471_v55  ;;  %v1362_v3 = vsel %vm1323_vm5, %v1097_v57, %v1361_v61  ;;  %v887_v4 = vadd.f32 %v886_v59, %v885_v50 }
  0xcb   :  { %v1099_v2 = vmul.f32 %v2165_v35, %v478_v56  ;;  %v485_v5 = vadd.f32 %v484_v60, %v483_v51  ;;  %v893_v8 = vrot.slane %v892_v0, 4  ;;  %v899_v9 = vsel %vm149_vm0, %v128_v58, 0.0 }
  0xcc   :  { %v883_v7 = vrot.slane %v882_v63, 1  ;;  %v1363_v10 = vsel %vm1325_vm6, %v1098_v1, %v1362_v3  ;;  %v888_v12 = vrot.slane %v887_v4, 2  ;;  %v900_v13 = vrot.slane %v899_v9, 4 }
  0xcd   :  { %v906_v14 = vsel %vm149_vm0, %v129_v62, 0.0  ;;  %v1100_v15 = vmul.f32 %v2165_v35, %v485_v5  ;;  %v1364_v16 = vsel %vm1327_vm7, %v1099_v2, %v1363_v10  ;;  %v894_v18 = vadd.f32 %v893_v8, %v892_v0  ;;  %v71_v2 = vld [vmem:[%s3022_s0 + $0x190] sm:$0xff] }
  0xce   :  { %v884_v17 = vadd.f32 %v883_v7, %v882_v63  ;;  %v889_v20 = vadd.f32 %v888_v12, %v887_v4  ;;  %v901_v21 = vadd.f32 %v900_v13, %v899_v9  ;;  %v907_v22 = vrot.slane %v906_v14, 4 }
  0xcf   :  { %v913_v23 = vsel %vm149_vm0, %v130_v6, 0.0  ;;  %v1365_v24 = vsel %vm1329_vm8, %v1100_v15, %v1364_v16  ;;  %v895_v25 = vrot.slane %v894_v18, 2  ;;  %v920_v27 = vsel %vm149_vm0, %v131_v11, 0.0  ;;  %v72_v11 = vld [vmem:[%s3022_s0 + $0x198] sm:$0xff] }
  0xd0   :  { %v914_v26 = vrot.slane %v913_v23, 4  ;;  %1917 = vmatmul.msk.f32.gmra.mxu0 %vm149_vm0, %v1365_v24  ;;  %v890_v28 = vrot.slane %v889_v20, 1  ;;  %v902_v29 = vrot.slane %v901_v21, 2  ;;  %v908_v30 = vadd.f32 %v907_v22, %v906_v14 }
  0xd1   :  { %v921_v31 = vrot.slane %v920_v27, 4  ;;  %v896_v33 = vadd.f32 %v895_v25, %v894_v18  ;;  %v927_v36 = vsel %vm149_vm0, %v132_v19, 0.0  ;;  %v1157_v37 = vmul.f32 %v2165_v35, %v884_v17  ;;  %v73_v19 = vld [vmem:[%s3022_s0 + $0x1a0] sm:$0xff] }
  0xd2   :  { %v915_v34 = vadd.f32 %v914_v26, %v913_v23  ;;  %v891_v39 = vadd.f32 %v890_v28, %v889_v20  ;;  %v903_v40 = vadd.f32 %v902_v29, %v901_v21  ;;  %v909_v41 = vrot.slane %v908_v30, 2  ;;  %v74_v20 = vld [vmem:[%s3022_s0 + $0x1a8] sm:$0xff]  ;;  %v75_v28 = vld [vmem:[%s3022_s0 + $0x1b0] sm:$0xff]  ;;  %v76_v29 = vld [vmem:[%s3022_s0 + $0x1b8] sm:$0xff] }
  0xd3   :  { %v922_v42 = vadd.f32 %v921_v31, %v920_v27  ;;  %v897_v43 = vrot.slane %v896_v33, 1  ;;  %v928_v45 = vrot.slane %v927_v36, 4  ;;  %v486_v46 = vsel %vm149_vm0, %v69_v32, 0.0 }
  0xd4   :  { %v916_v44 = vrot.slane %v915_v34, 2  ;;  %v904_v38 = vrot.slane %v903_v40, 1  ;;  %v910_v47 = vadd.f32 %v909_v41, %v908_v30  ;;  %v1158_v49 = vmul.f32 %v2165_v35, %v891_v39 }
  0xd5   :  { %v923_v48 = vrot.slane %v922_v42, 2  ;;  %v898_v50 = vadd.f32 %v897_v43, %v896_v33  ;;  %v929_v52 = vadd.f32 %v928_v45, %v927_v36  ;;  %v487_v54 = vrot.slane %v486_v46, 4 }
  0xd6   :  { %v917_v51 = vadd.f32 %v916_v44, %v915_v34  ;;  %v905_v55 = vadd.f32 %v904_v38, %v903_v40  ;;  %v911_v56 = vrot.slane %v910_v47, 1  ;;  %v1415_v58 = vsel %vm1317_vm1, %v1158_v49, %v1157_v37 }
  0xd7   :  { %v924_v57 = vadd.f32 %v923_v48, %v922_v42  ;;  %v930_v60 = vrot.slane %v929_v52, 2  ;;  %v1159_v61 = vmul.f32 %v2165_v35, %v898_v50  ;;  %v488_v62 = vadd.f32 %v487_v54, %v486_v46  ;;  %v133_v50 = vld [vmem:[%s3022_s0 + $0x380] sm:$0xff] }
  0xd8   :  { %v918_v59 = vrot.slane %v917_v51, 1  ;;  %v912_v63 = vadd.f32 %v911_v56, %v910_v47  ;;  %v1160_v1 = vmul.f32 %v2165_v35, %v905_v55  ;;  %v493_v3 = vsel %vm149_vm0, %v70_v53, 0.0 }
  0xd9   :  { %v925_v0 = vrot.slane %v924_v57, 1  ;;  %v931_v5 = vadd.f32 %v930_v60, %v929_v52  ;;  %v1416_v6 = vsel %vm1319_vm3, %v1159_v61, %v1415_v58  ;;  %v489_v7 = vrot.slane %v488_v62, 2 }
  0xda   :  { %v919_v4 = vadd.f32 %v918_v59, %v917_v51  ;;  %v1161_v9 = vmul.f32 %v2165_v35, %v912_v63  ;;  %v1417_v10 = vsel %vm1321_vm4, %v1160_v1, %v1416_v6  ;;  %v494_v12 = vrot.slane %v493_v3, 4  ;;  %v134_v6 = vld [vmem:[%s3022_s0 + $0x388] sm:$0xff] }
  0xdb   :  { %v926_v8 = vadd.f32 %v925_v0, %v924_v57  ;;  %v932_v13 = vrot.slane %v931_v5, 1  ;;  %v490_v15 = vadd.f32 %v489_v7, %v488_v62  ;;  %v500_v16 = vsel %vm149_vm0, %v71_v2, 0.0 }
  0xdc   :  { %v1162_v14 = vmul.f32 %v2165_v35, %v919_v4  ;;  %v1418_v18 = vsel %vm1323_vm5, %v1161_v9, %v1417_v10  ;;  %v495_v21 = vadd.f32 %v494_v12, %v493_v3  ;;  %v501_v22 = vrot.slane %v500_v16, 4 }
  0xdd   :  { %v1163_v17 = vmul.f32 %v2165_v35, %v926_v8  ;;  %v933_v23 = vadd.f32 %v932_v13, %v931_v5  ;;  %v491_v25 = vrot.slane %v490_v15, 1  ;;  %v507_v26 = vsel %vm149_vm0, %v72_v11, 0.0 }
  0xde   :  { %v1419_v24 = vsel %vm1325_vm6, %v1162_v14, %v1418_v18  ;;  %v496_v30 = vrot.slane %v495_v21, 2  ;;  %v502_v31 = vadd.f32 %v501_v22, %v500_v16  ;;  %v508_v32 = vrot.slane %v507_v26, 4 }
  0xdf   :  { %v1420_v27 = vsel %vm1327_vm7, %v1163_v17, %v1419_v24  ;;  %v1164_v33 = vmul.f32 %v2165_v35, %v933_v23  ;;  %v492_v34 = vadd.f32 %v491_v25, %v490_v15  ;;  %v514_v36 = vsel %vm149_vm0, %v73_v19, 0.0  ;;  %v135_v15 = vld [vmem:[%s3022_s0 + $0x390] sm:$0xff]  ;;  %v136_v24 = vld [vmem:[%s3022_s0 + $0x398] sm:$0xff] }
  0xe0   :  { %v521_v37 = vsel %vm149_vm0, %v74_v20, 0.0  ;;  %v497_v39 = vadd.f32 %v496_v30, %v495_v21  ;;  %v503_v40 = vrot.slane %v502_v31, 2  ;;  %v509_v41 = vadd.f32 %v508_v32, %v507_v26 }
  0xe1   :  { %v515_v42 = vrot.slane %v514_v36, 4  ;;  %v1421_v43 = vsel %vm1329_vm8, %v1164_v33, %v1420_v27  ;;  %v522_v44 = vrot.slane %v521_v37, 4  ;;  %v528_v45 = vsel %vm149_vm0, %v75_v28, 0.0  ;;  %v137_v33 = vld [vmem:[%s3022_s0 + $0x3a0] sm:$0xff] }
  0xe2   :  { %v535_v46 = vsel %vm149_vm0, %v76_v29, 0.0  ;;  %1925 = vmatmul.msk.f32.gmra.mxu2 %vm149_vm0, %v1421_v43  ;;  %v498_v38 = vrot.slane %v497_v39, 1  ;;  %v504_v47 = vadd.f32 %v503_v40, %v502_v31  ;;  %v510_v48 = vrot.slane %v509_v41, 2 }
  0xe3   :  { %v516_v49 = vadd.f32 %v515_v42, %v514_v36  ;;  %v523_v51 = vadd.f32 %v522_v44, %v521_v37  ;;  %v529_v52 = vrot.slane %v528_v45, 4  ;;  %v536_v53 = vrot.slane %v535_v46, 4  ;;  %v138_v37 = vld [vmem:[%s3022_s0 + $0x3a8] sm:$0xff] }
  0xe4   :  { %v1101_v54 = vmul.f32 %v2165_v35, %v492_v34  ;;  %v499_v55 = vadd.f32 %v498_v38, %v497_v39  ;;  %v505_v56 = vrot.slane %v504_v47, 1  ;;  %v511_v57 = vadd.f32 %v510_v48, %v509_v41  ;;  %v140_v38 = vld [vmem:[%s3022_s0 + $0x3b8] sm:$0xff] }
  0xe5   :  { %v517_v58 = vrot.slane %v516_v49, 2  ;;  %v524_v59 = vrot.slane %v523_v51, 2  ;;  %v530_v60 = vadd.f32 %v529_v52, %v528_v45  ;;  %v537_v61 = vadd.f32 %v536_v53, %v535_v46  ;;  %v139_v46 = vld [vmem:[%s3022_s0 + $0x3b0] sm:$0xff] }
  0xe6   :  { %v934_v62 = vsel %vm149_vm0, %v133_v50, 0.0  ;;  %v506_v63 = vadd.f32 %v505_v56, %v504_v47  ;;  %v512_v0 = vrot.slane %v511_v57, 1  ;;  %v1102_v2 = vmul.f32 %v2165_v35, %v499_v55 }
  0xe7   :  { %v518_v1 = vadd.f32 %v517_v58, %v516_v49  ;;  %v525_v3 = vadd.f32 %v524_v59, %v523_v51  ;;  %v531_v4 = vrot.slane %v530_v60, 2  ;;  %v538_v5 = vrot.slane %v537_v61, 2 }
  0xe8   :  { %v935_v7 = vrot.slane %v934_v62, 4  ;;  %v513_v8 = vadd.f32 %v512_v0, %v511_v57  ;;  %v1103_v10 = vmul.f32 %v2165_v35, %v506_v63  ;;  %v1366_v11 = vsel %vm1317_vm1, %v1102_v2, %v1101_v54 }
  0xe9   :  { %v519_v9 = vrot.slane %v518_v1, 1  ;;  %v526_v12 = vrot.slane %v525_v3, 1  ;;  %v532_v13 = vadd.f32 %v531_v4, %v530_v60  ;;  %v539_v14 = vadd.f32 %v538_v5, %v537_v61 }
  0xea   :  { %v936_v16 = vadd.f32 %v935_v7, %v934_v62  ;;  %v1104_v18 = vmul.f32 %v2165_v35, %v513_v8  ;;  %v1367_v19 = vsel %vm1319_vm3, %v1103_v10, %v1366_v11  ;;  %v941_v20 = vsel %vm149_vm0, %v134_v6, 0.0 }
  0xeb   :  { %v520_v17 = vadd.f32 %v519_v9, %v518_v1  ;;  %v527_v21 = vadd.f32 %v526_v12, %v525_v3  ;;  %v533_v22 = vrot.slane %v532_v13, 1  ;;  %v540_v23 = vrot.slane %v539_v14, 1  ;;  %v77_v3 = vld [vmem:[%s3022_s0 + $0x1c0] sm:$0xff] }
  0xec   :  { %v937_v25 = vrot.slane %v936_v16, 2  ;;  %v1368_v27 = vsel %vm1321_vm4, %v1104_v18, %v1367_v19  ;;  %v942_v28 = vrot.slane %v941_v20, 4  ;;  %v948_v29 = vsel %vm149_vm0, %v135_v15, 0.0 }
  0xed   :  { %v1105_v26 = vmul.f32 %v2165_v35, %v520_v17  ;;  %v534_v30 = vadd.f32 %v533_v22, %v532_v13  ;;  %v541_v31 = vadd.f32 %v540_v23, %v539_v14  ;;  %v1106_v32 = vmul.f32 %v2165_v35, %v527_v21  ;;  %v78_v23 = vld [vmem:[%s3022_s0 + $0x1c8] sm:$0xff] }
  0xee   :  { %v938_v34 = vadd.f32 %v937_v25, %v936_v16  ;;  %v943_v39 = vadd.f32 %v942_v28, %v941_v20  ;;  %v949_v40 = vrot.slane %v948_v29, 4  ;;  %v955_v41 = vsel %vm149_vm0, %v136_v24, 0.0 }
  0xef   :  { %v1369_v36 = vsel %vm1323_vm5, %v1105_v26, %v1368_v27  ;;  %v1107_v42 = vmul.f32 %v2165_v35, %v534_v30  ;;  %v1108_v43 = vmul.f32 %v2165_v35, %v541_v31  ;;  %v956_v49 = vrot.slane %v955_v41, 4 }
  0xf0   :  { %v1370_v44 = vsel %vm1325_vm6, %v1106_v32, %v1369_v36  ;;  %v939_v45 = vrot.slane %v938_v34, 1  ;;  %v944_v47 = vrot.slane %v943_v39, 2  ;;  %v950_v48 = vadd.f32 %v949_v40, %v948_v29  ;;  %v79_v32 = vld [vmem:[%s3022_s0 + $0x1d0] sm:$0xff] }
  0xf1   :  { %v962_v50 = vsel %vm149_vm0, %v137_v33, 0.0  ;;  %v1371_v51 = vsel %vm1327_vm7, %v1107_v42, %v1370_v44  ;;  %v969_v54 = vsel %vm149_vm0, %v138_v37, 0.0  ;;  %v957_v58 = vadd.f32 %v956_v49, %v955_v41 }
  0xf2   :  { %v940_v52 = vadd.f32 %v939_v45, %v938_v34  ;;  %v963_v53 = vrot.slane %v962_v50, 4  ;;  %v1372_v55 = vsel %vm1329_vm8, %v1108_v43, %v1371_v51  ;;  %v945_v56 = vadd.f32 %v944_v47, %v943_v39  ;;  %v80_v43 = vld [vmem:[%s3022_s0 + $0x1d8] sm:$0xff]  ;;  %v81_v51 = vld [vmem:[%s3022_s0 + $0x1e0] sm:$0xff] }
  0xf3   :  { %v951_v57 = vrot.slane %v950_v48, 2  ;;  %1918 = vmatmul.msk.f32.gmra.mxu0 %vm149_vm0, %v1372_v55  ;;  %v970_v60 = vrot.slane %v969_v54, 4  ;;  %v976_v61 = vsel %vm149_vm0, %v139_v46, 0.0  ;;  %v983_v62 = vsel %vm149_vm0, %v140_v38, 0.0 }
  0xf4   :  { %v964_v59 = vadd.f32 %v963_v53, %v962_v50  ;;  %v946_v63 = vrot.slane %v945_v56, 1  ;;  %v958_v1 = vrot.slane %v957_v58, 2  ;;  %v977_v2 = vrot.slane %v976_v61, 4 }
  0xf5   :  { %v952_v0 = vadd.f32 %v951_v57, %v950_v48  ;;  %v971_v5 = vadd.f32 %v970_v60, %v969_v54  ;;  %v984_v6 = vrot.slane %v983_v62, 4  ;;  %v1165_v7 = vmul.f32 %v2165_v35, %v940_v52  ;;  %v83_v60 = vld [vmem:[%s3022_s0 + $0x1f0] sm:$0xff] }
  0xf6   :  { %v965_v4 = vrot.slane %v964_v59, 2  ;;  %v947_v8 = vadd.f32 %v946_v63, %v945_v56  ;;  %v959_v10 = vadd.f32 %v958_v1, %v957_v58  ;;  %v978_v11 = vadd.f32 %v977_v2, %v976_v61 }
  0xf7   :  { %v953_v9 = vrot.slane %v952_v0, 1  ;;  %v972_v13 = vrot.slane %v971_v5, 2  ;;  %v985_v14 = vadd.f32 %v984_v6, %v983_v62  ;;  %v542_v15 = vsel %vm149_vm0, %v77_v3, 0.0 }
  0xf8   :  { %v966_v12 = vadd.f32 %v965_v4, %v964_v59  ;;  %v960_v17 = vrot.slane %v959_v10, 1  ;;  %v979_v18 = vrot.slane %v978_v11, 2  ;;  %v1166_v19 = vmul.f32 %v2165_v35, %v947_v8  ;;  %v82_v59 = vld [vmem:[%s3022_s0 + $0x1e8] sm:$0xff]  ;;  %v84_v4 = vld [vmem:[%s3022_s0 + $0x1f8] sm:$0xff] }
  0xf9   :  { %v954_v16 = vadd.f32 %v953_v9, %v952_v0  ;;  %v973_v21 = vadd.f32 %v972_v13, %v971_v5  ;;  %v986_v22 = vrot.slane %v985_v14, 2  ;;  %v543_v24 = vrot.slane %v542_v15, 4 }
  0xfa   :  { %v967_v20 = vrot.slane %v966_v12, 1  ;;  %v961_v25 = vadd.f32 %v960_v17, %v959_v10  ;;  %v980_v26 = vadd.f32 %v979_v18, %v978_v11  ;;  %v1422_v28 = vsel %vm1317_vm1, %v1166_v19, %v1165_v7 }
  0xfb   :  { %v1167_v27 = vmul.f32 %v2165_v35, %v954_v16  ;;  %v974_v30 = vrot.slane %v973_v21, 1  ;;  %v987_v31 = vadd.f32 %v986_v22, %v985_v14  ;;  %v544_v33 = vadd.f32 %v543_v24, %v542_v15  ;;  %v141_v16 = vld [vmem:[%s3022_s0 + $0x3c0] sm:$0xff] }
  0xfc   :  { %v968_v29 = vadd.f32 %v967_v20, %v966_v12  ;;  %v981_v34 = vrot.slane %v980_v26, 1  ;;  %v1168_v36 = vmul.f32 %v2165_v35, %v961_v25  ;;  %v549_v39 = vsel %vm149_vm0, %v78_v23, 0.0 }
  0xfd   :  { %v1423_v37 = vsel %vm1319_vm3, %v1167_v27, %v1422_v28  ;;  %v975_v40 = vadd.f32 %v974_v30, %v973_v21  ;;  %v988_v41 = vrot.slane %v987_v31, 1  ;;  %v545_v44 = vrot.slane %v544_v33, 2 }
  0xfe   :  { %v1169_v42 = vmul.f32 %v2165_v35, %v968_v29  ;;  %v982_v45 = vadd.f32 %v981_v34, %v980_v26  ;;  %v1424_v46 = vsel %vm1321_vm4, %v1168_v36, %v1423_v37  ;;  %v550_v38 = vrot.slane %v549_v39, 4  ;;  %v1535_v34 = vld [vmem:[%s3025_s3 + $0x10] sm:$0xff] }
  0xff   :  { %v556_v47 = vsel %vm149_vm0, %v79_v32, 0.0  ;;  %v989_v48 = vadd.f32 %v988_v41, %v987_v31  ;;  %v1170_v49 = vmul.f32 %v2165_v35, %v975_v40  ;;  %v546_v52 = vadd.f32 %v545_v44, %v544_v33  ;;  %v1536_v33 = vld [vmem:[%s3025_s3 + $0x18] sm:$0xff] }
 0x100   :  { %v1425_v50 = vsel %vm1323_vm5, %v1169_v42, %v1424_v46  ;;  %v1171_v53 = vmul.f32 %v2165_v35, %v982_v45  ;;  %v551_v54 = vadd.f32 %v550_v38, %v549_v39  ;;  %v557_v55 = vrot.slane %v556_v47, 4  ;;  %1601 = vmatpush.msra.mxu1 %v1536_v33  ;;  %1948 = vmatpush.msra.mxu3 %v1536_v33  ;;  %v142_v45 = vld [vmem:[%s3022_s0 + $0x3c8] sm:$0xff] }
 0x101   :  { %v563_v56 = vsel %vm149_vm0, %v80_v43, 0.0  ;;  %v1172_v57 = vmul.f32 %v2165_v35, %v989_v48  ;;  %v1426_v58 = vsel %vm1325_vm6, %v1170_v49, %v1425_v50  ;;  %v547_v61 = vrot.slane %v546_v52, 1  ;;  %v1534_v46 = vld [vmem:[%s3025_s3 + $0x8] sm:$0xff] }
 0x102   :  { %v564_v62 = vrot.slane %v563_v56, 4  ;;  %v1427_v63 = vsel %vm1327_vm7, %v1171_v53, %v1426_v58  ;;  %v552_v0 = vrot.slane %v551_v54, 2  ;;  %v558_v1 = vadd.f32 %v557_v55, %v556_v47  ;;  %1602 = vmatpush.msra.mxu1 %v1535_v34  ;;  %1949 = vmatpush.msra.mxu3 %v1535_v34  ;;  %v2835_v55 = vpop.f32.mrf.mxu0 }
 0x103   :  { %v570_v2 = vsel %vm149_vm0, %v81_v51, 0.0  ;;  %v1428_v3 = vsel %vm1329_vm8, %v1172_v57, %v1427_v63  ;;  %v548_v5 = vadd.f32 %v547_v61, %v546_v52  ;;  %v577_v10 = vsel %vm149_vm0, %v82_v59, 0.0 }
 0x104   :  { %v565_v6 = vadd.f32 %v564_v62, %v563_v56  ;;  %v571_v7 = vrot.slane %v570_v2, 4  ;;  %1926 = vmatmul.msk.f32.gmra.mxu2 %vm149_vm0, %v1428_v3  ;;  %v553_v8 = vadd.f32 %v552_v0, %v551_v54  ;;  %v559_v9 = vrot.slane %v558_v1, 2  ;;  %v143_v54 = vld [vmem:[%s3022_s0 + $0x3d0] sm:$0xff]  ;;  %v1533_v56 = vld [vmem:[%s3025_s3] sm:$0xff]  ;;  %1603 = vmatpush.msra.mxu1 %v1534_v46 }
 0x105   :  { %v584_v11 = vsel %vm149_vm0, %v83_v60, 0.0  ;;  %v578_v14 = vrot.slane %v577_v10, 4  ;;  %v591_v19 = vsel %vm149_vm0, %v84_v4, 0.0  ;;  %v1109_v20 = vmul.f32 %v2165_v35, %v548_v5  ;;  %1950 = vmatpush.msra.mxu3 %v1534_v46  ;;  %v145_v3 = vld [vmem:[%s3022_s0 + $0x3e0] sm:$0xff] }
 0x106   :  { %v566_v12 = vrot.slane %v565_v6, 2  ;;  %v572_v13 = vadd.f32 %v571_v7, %v570_v2  ;;  %v585_v15 = vrot.slane %v584_v11, 4  ;;  %v554_v17 = vrot.slane %v553_v8, 1  ;;  %1604 = vmatpush.msra.mxu1 %v1533_v56 }
 0x107   :  { %v560_v18 = vadd.f32 %v559_v9, %v558_v1  ;;  %v579_v23 = vadd.f32 %v578_v14, %v577_v10  ;;  %v592_v27 = vrot.slane %v591_v19, 4  ;;  %v990_v28 = vsel %vm149_vm0, %v141_v16, 0.0  ;;  %v144_v1 = vld [vmem:[%s3022_s0 + $0x3d8] sm:$0xff]  ;;  %1951 = vmatpush.msra.mxu3 %v1533_v56 }
 0x108   :  { %v567_v21 = vadd.f32 %v566_v12, %v565_v6  ;;  %v573_v22 = vrot.slane %v572_v13, 2  ;;  %v586_v24 = vadd.f32 %v585_v15, %v584_v11  ;;  %v555_v25 = vadd.f32 %v554_v17, %v553_v8  ;;  %v1509_v11 = vpop.f32.mrf.mxu2 }
 0x109   :  { %v561_v26 = vrot.slane %v560_v18, 1  ;;  %v580_v31 = vrot.slane %v579_v23, 2  ;;  %v593_v37 = vadd.f32 %v592_v27, %v591_v19  ;;  %v991_v40 = vrot.slane %v990_v28, 4 }
 0x10a   :  { %v568_v29 = vrot.slane %v567_v21, 1  ;;  %v574_v30 = vadd.f32 %v573_v22, %v572_v13  ;;  %v587_v32 = vrot.slane %v586_v24, 2  ;;  %v1110_v39 = vmul.f32 %v2165_v35, %v555_v25  ;;  %v146_v13 = vld [vmem:[%s3022_s0 + $0x3e8] sm:$0xff] }
 0x10b   :  { %v562_v36 = vadd.f32 %v561_v26, %v560_v18  ;;  %v581_v43 = vadd.f32 %v580_v31, %v579_v23  ;;  %v594_v38 = vrot.slane %v593_v37, 2  ;;  %v992_v49 = vadd.f32 %v991_v40, %v990_v28  ;;  %v147_v18 = vld [vmem:[%s3022_s0 + $0x3f0] sm:$0xff]  ;;  %v148_v26 = vld [vmem:[%s3022_s0 + $0x3f8] sm:$0xff] }
 0x10c   :  { %v569_v41 = vadd.f32 %v568_v29, %v567_v21  ;;  %v575_v42 = vrot.slane %v574_v30, 1  ;;  %v588_v44 = vadd.f32 %v587_v32, %v586_v24  ;;  %v1373_v48 = vsel %vm1317_vm1, %v1110_v39, %v1109_v20 }
 0x10d   :  { %v1111_v47 = vmul.f32 %v2165_v35, %v562_v36  ;;  %v582_v51 = vrot.slane %v581_v43, 1  ;;  %v595_v57 = vadd.f32 %v594_v38, %v593_v37  ;;  %v993_v59 = vrot.slane %v992_v49, 2  ;;  %v2874_v36 = vld [vmem:[%s3024_s2] ss:$0 sm:$0xff] }
 0x10e   :  { %v576_v50 = vadd.f32 %v575_v42, %v574_v30  ;;  %v589_v52 = vrot.slane %v588_v44, 1  ;;  %v1112_v53 = vmul.f32 %v2165_v35, %v569_v41  ;;  %v997_v60 = vsel %vm149_vm0, %v142_v45, 0.0  ;;  %v1488_v42 = vpop.f32.mrf.mxu0 }
 0x10f   :  { %v1374_v58 = vsel %vm1319_vm3, %v1111_v47, %v1373_v48  ;;  %v583_v61 = vadd.f32 %v582_v51, %v581_v43  ;;  %v596_v2 = vrot.slane %v595_v57, 1  ;;  %v994_v4 = vadd.f32 %v993_v59, %v992_v49 }
 0x110   :  { %v590_v62 = vadd.f32 %v589_v52, %v588_v44  ;;  %v1113_v63 = vmul.f32 %v2165_v35, %v576_v50  ;;  %v1375_v0 = vsel %vm1321_vm4, %v1112_v53, %v1374_v58  ;;  %v998_v5 = vrot.slane %v997_v60, 4  ;;  %v1512_v59 = vpop.f32.mrf.mxu2 }
 0x111   :  { %v1004_v6 = vsel %vm149_vm0, %v143_v54, 0.0  ;;  %v1114_v7 = vmul.f32 %v2165_v35, %v583_v61  ;;  %v597_v12 = vadd.f32 %v596_v2, %v595_v57  ;;  %v995_v14 = vrot.slane %v994_v4, 1 }
 0x112   :  { %v1115_v8 = vmul.f32 %v2165_v35, %v590_v62  ;;  %v1376_v9 = vsel %vm1323_vm5, %v1113_v63, %v1375_v0  ;;  %v1005_v10 = vrot.slane %v1004_v6, 4  ;;  %v999_v15 = vadd.f32 %v998_v5, %v997_v60 }
 0x113   :  { %v1011_v16 = vsel %vm149_vm0, %v144_v1, 0.0  ;;  %v1377_v17 = vsel %vm1325_vm6, %v1114_v7, %v1376_v9  ;;  %v1018_v21 = vsel %vm149_vm0, %v145_v3, 0.0  ;;  %v1116_v22 = vmul.f32 %v2165_v35, %v597_v12 }
 0x114   :  { %v1006_v19 = vadd.f32 %v1005_v10, %v1004_v6  ;;  %v1012_v20 = vrot.slane %v1011_v16, 4  ;;  %v1378_v23 = vsel %vm1327_vm7, %v1115_v8, %v1377_v17  ;;  %v996_v24 = vadd.f32 %v995_v14, %v994_v4 }
 0x115   :  { %v1000_v25 = vrot.slane %v999_v15, 2  ;;  %v1019_v29 = vrot.slane %v1018_v21, 4  ;;  %v1025_v30 = vsel %vm149_vm0, %v146_v13, 0.0  ;;  %v1379_v31 = vsel %vm1329_vm8, %v1116_v22, %v1378_v23 }
 0x116   :  { %v1007_v27 = vrot.slane %v1006_v19, 2  ;;  %v1013_v28 = vadd.f32 %v1012_v20, %v1011_v16  ;;  %v1026_v33 = vrot.slane %v1025_v30, 4  ;;  %v1032_v34 = vsel %vm149_vm0, %v147_v18, 0.0  ;;  %1919 = vmatmul.msk.f32.gmra.mxu0 %vm149_vm0, %v1379_v31  ;;  %v1491_v16 = vpop.f32.mrf.mxu0 }
 0x117   :  { %v1001_v32 = vadd.f32 %v1000_v25, %v999_v15  ;;  %v1020_v40 = vadd.f32 %v1019_v29, %v1018_v21  ;;  %v1033_v41 = vrot.slane %v1032_v34, 4  ;;  %v1039_v45 = vsel %vm149_vm0, %v148_v26, 0.0 }
 0x118   :  { %v1008_v37 = vadd.f32 %v1007_v27, %v1006_v19  ;;  %v1014_v39 = vrot.slane %v1013_v28, 2  ;;  %v1027_v44 = vadd.f32 %v1026_v33, %v1025_v30  ;;  %v1173_v46 = vmul.f32 %v2165_v35, %v996_v24  ;;  %v1515_v25 = vpop.f32.mrf.mxu2 }
 0x119   :  { %v1002_v43 = vrot.slane %v1001_v32, 1  ;;  %v1021_v48 = vrot.slane %v1020_v40, 2  ;;  %v1034_v49 = vadd.f32 %v1033_v41, %v1032_v34  ;;  %v1040_v52 = vrot.slane %v1039_v45, 4 }
 0x11a   :  { %v1009_v38 = vrot.slane %v1008_v37, 1  ;;  %v1015_v47 = vadd.f32 %v1014_v39, %v1013_v28  ;;  %v1028_v51 = vrot.slane %v1027_v44, 2  ;;  %v1486_v53 = vadd.f32 %v2874_v36, %v2835_v55 }
 0x11b   :  { %v1003_v50 = vadd.f32 %v1002_v43, %v1001_v32  ;;  %v1022_v57 = vadd.f32 %v1021_v48, %v1020_v40  ;;  %v1035_v58 = vrot.slane %v1034_v49, 2  ;;  %v1041_v61 = vadd.f32 %v1040_v52, %v1039_v45 }
 0x11c   :  { %v1010_v54 = vadd.f32 %v1009_v38, %v1008_v37  ;;  %v1016_v56 = vrot.slane %v1015_v47, 1  ;;  %v1029_v60 = vadd.f32 %v1028_v51, %v1027_v44  ;;  %1928 = vmatmul.msk.f32.vlgmr.msra.gmra.mxu1 %vm149_vm0, %v1486_v53  ;;  %v1510_v63 = vadd.f32 %v2874_v36, %v1509_v11 }
 0x11d   :  { %v1174_v62 = vmul.f32 %v2165_v35, %v1003_v50  ;;  %v1023_v1 = vrot.slane %v1022_v57, 1  ;;  %v1036_v2 = vadd.f32 %v1035_v58, %v1034_v49  ;;  %v1042_v55 = vrot.slane %v1041_v61, 2  ;;  %v2927_v49 = vld [vmem:[%s3026_s4] ss:$0 sm:$0xff]  ;;  %s2051_s4 = smov [#allocation2]  }
 0x11e   :  { %v1017_v0 = vadd.f32 %v1016_v56, %v1015_v47  ;;  %v1175_v3 = vmul.f32 %v2165_v35, %v1010_v54  ;;  %v1030_v4 = vrot.slane %v1029_v60, 1  ;;  %1936 = vmatmul.msk.f32.vlgmr.msra.gmra.mxu3 %vm149_vm0, %v1510_v63  ;;  %v1489_v11 = vadd.f32 %v2874_v36, %v1488_v42  ;;  %v1494_v30 = vpop.f32.mrf.mxu0  ;;  %s1898_s6 = sshll.u32 %s2051_s4, 4  ;;  %s1899_s6 = int_to_ptr.vmem [resolvable:$true] %s1898_s6 }
 0x11f   :  { %v1429_v5 = vsel %vm1317_vm1, %v1174_v62, %v1173_v46  ;;  %v1024_v6 = vadd.f32 %v1023_v1, %v1022_v57  ;;  %v1037_v7 = vrot.slane %v1036_v2, 1  ;;  %v1043_v12 = vadd.f32 %v1042_v55, %v1041_v61 }
 0x120   :  { %v1176_v8 = vmul.f32 %v2165_v35, %v1017_v0  ;;  %v1430_v9 = vsel %vm1319_vm3, %v1175_v3, %v1429_v5  ;;  %v1031_v10 = vadd.f32 %v1030_v4, %v1029_v60  ;;  %v1513_v19 = vadd.f32 %v2874_v36, %v1512_v59  ;;  %v1518_v31 = vpop.f32.mrf.mxu2 }
 0x121   :  { %v1038_v13 = vadd.f32 %v1037_v7, %v1036_v2  ;;  %v1177_v14 = vmul.f32 %v2165_v35, %v1024_v6  ;;  %v1044_v17 = vrot.slane %v1043_v12, 1  ;;  %v1492_v28 = vadd.f32 %v2874_v36, %v1491_v16 }
 0x122   :  { %v1431_v15 = vsel %vm1321_vm4, %v1176_v8, %v1430_v9  ;;  %v1178_v18 = vmul.f32 %v2165_v35, %v1031_v10  ;;  %v1516_v29 = vadd.f32 %v2874_v36, %v1515_v25  ;;  %v1495_v32 = vadd.f32 %v2874_v36, %v1494_v30 }
 0x123   :  { %v1179_v20 = vmul.f32 %v2165_v35, %v1038_v13  ;;  %v1432_v21 = vsel %vm1323_vm5, %v1177_v14, %v1431_v15  ;;  %v1045_v22 = vadd.f32 %v1044_v17, %v1043_v12 }
 0x124   :  { %v1433_v23 = vsel %vm1325_vm6, %v1178_v18, %v1432_v21  ;;  %1929 = vmatmul.msk.f32.gmra.mxu1 %vm149_vm0, %v1489_v11 }
 0x125   :  { %v1434_v24 = vsel %vm1327_vm7, %v1179_v20, %v1433_v23  ;;  %v1180_v26 = vmul.f32 %v2165_v35, %v1045_v22  ;;  %v1519_v35 = vadd.f32 %v2874_v36, %v1518_v31 }
 0x126   :  { %1937 = vmatmul.msk.f32.gmra.mxu3 %vm149_vm0, %v1513_v19 }
 0x127   :  { %v1435_v27 = vsel %vm1329_vm8, %v1180_v26, %v1434_v24 }
 0x128   :  { %1927 = vmatmul.msk.f32.gmra.mxu2 %vm149_vm0, %v1435_v27 }
 0x129   :  { %v1497_v33 = vpop.f32.mrf.mxu0 }
 0x12a   :  { %v1498_v34 = vadd.f32 %v2874_v36, %v1497_v33 }
 0x12c   :  { %1930 = vmatmul.msk.f32.gmra.mxu1 %vm149_vm0, %v1492_v28 }
 0x12e   :  { %1938 = vmatmul.msk.f32.gmra.mxu3 %vm149_vm0, %v1516_v29 }
 0x134   :  { %1931 = vmatmul.msk.f32.gmra.mxu1 %vm149_vm0, %v1495_v32 }
 0x136   :  { %1939 = vmatmul.msk.f32.gmra.mxu3 %vm149_vm0, %v1519_v35 }
 0x13c   :  { %1932 = vmatmul.msk.f32.gmra.mxu1 %vm149_vm0, %v1498_v34 }
 0x141   :  { %v1521_v37 = vpop.f32.mrf.mxu2 }
 0x142   :  { %v1522_v39 = vadd.f32 %v2874_v36, %v1521_v37 }
 0x144   :  { %1940 = vmatmul.msk.f32.gmra.mxu3 %vm149_vm0, %v1522_v39 }
 0x14d   :  { %v1500_v40 = vpop.f32.mrf.mxu0 }
 0x14e   :  { %v1501_v41 = vadd.f32 %v2874_v36, %v1500_v40 }
 0x150   :  { %1933 = vmatmul.msk.f32.gmra.mxu1 %vm149_vm0, %v1501_v41 }
 0x165   :  { %v1524_v42 = vpop.f32.mrf.mxu2 }
 0x166   :  { %v1525_v43 = vadd.f32 %v2874_v36, %v1524_v42 }
 0x168   :  { %1941 = vmatmul.msk.f32.gmra.mxu3 %vm149_vm0, %v1525_v43 }
 0x170   :  { %v1503_v44 = vpop.f32.mrf.mxu0 }
 0x171   :  { %v1504_v45 = vadd.f32 %v2874_v36, %v1503_v44 }
 0x173   :  { %1934 = vmatmul.msk.f32.gmra.mxu1 %vm149_vm0, %v1504_v45 }
 0x187   :  { %v1527_v46 = vpop.f32.mrf.mxu2 }
 0x188   :  { %v1528_v38 = vadd.f32 %v2874_v36, %v1527_v46 }
 0x18a   :  { %1942 = vmatmul.msk.f32.gmra.mxu3 %vm149_vm0, %v1528_v38 }
 0x193   :  { %v1506_v47 = vpop.f32.mrf.mxu0 }
 0x194   :  { %v1507_v48 = vadd.f32 %v2874_v36, %v1506_v47 }
 0x196   :  { %1935 = vmatmul.msk.f32.gmra.mxu1 %vm149_vm0, %v1507_v48 }
 0x199   :  { %v1606_v50 = vpop.f32.mrf.mxu1 }
 0x19a   :  { %v1607_v51 = vadd.f32 %v2927_v49, %v1606_v50 }
 0x19c   :  { %v1670_v52 = vmin.f32 %v1607_v51, 20.0  ;;  %vm1654_vm10 = vcmp.gt.f32.partialorder %v1607_v51, 20.0 }
 0x19e   :  { %v1686_v53 = vmul.f32 1.442695, %v1670_v52 }
 0x1a0   :  { %1960 = vpow2.f32 %v1686_v53 }
 0x1a1   :  { %v1609_v54 = vpop.f32.mrf.mxu1  ;;  %v1630_v56 = vpop.f32.mrf.mxu3 }
 0x1a2   :  { %v2932_v57 = vadd.f32 %v2927_v49, %v1609_v54  ;;  %v2935_v58 = vadd.f32 %v2927_v49, %v1630_v56 }
 0x1a4   :  { %v1671_v59 = vmin.f32 %v2932_v57, 20.0  ;;  %v1678_v60 = vmin.f32 %v2935_v58, 20.0  ;;  %vm1655_vm11 = vcmp.gt.f32.partialorder %v2932_v57, 20.0  ;;  %vm1662_vm14 = vcmp.gt.f32.partialorder %v2935_v58, 20.0 }
 0x1a6   :  { %v1961_v61 = vpop.eup %1960  ;;  %v1688_v62 = vmul.f32 1.442695, %v1671_v59  ;;  %v1702_v63 = vmul.f32 1.442695, %v1678_v60 }
 0x1a7   :  { %v1718_v0 = vadd.f32 1.0, %v1961_v61  ;;  %v1721_v1 = vmul.f32 -0.5, %v1961_v61  ;;  %v1724_v6 = vand.u32 2147483647, %v1961_v61 }
 0x1a8   :  { %1962 = vpow2.f32 %v1688_v62 }
 0x1a9   :  { %1964 = vlog2.f32 %v1718_v0  ;;  %v1612_v2 = vpop.f32.mrf.mxu1  ;;  %v1633_v3 = vpop.f32.mrf.mxu3  ;;  %v1722_v4 = vadd.f32 1.0, %v1721_v1  ;;  %vm2949_vm9 = vcmp.lt.f32.partialorder %v1724_v6, 0.0004427343 }
 0x1aa   :  { %1966 = vpow2.f32 %v1702_v63  ;;  %v2940_v55 = vadd.f32 %v2927_v49, %v1612_v2  ;;  %v2943_v5 = vadd.f32 %v2927_v49, %v1633_v3 }
 0x1ab   :  { %v1530_v7 = vpop.f32.mrf.mxu2  ;;  %v1723_v11 = vmul.f32 %v1961_v61, %v1722_v4 }
 0x1ac   :  { %v1672_v8 = vmin.f32 %v2940_v55, 20.0  ;;  %v1679_v9 = vmin.f32 %v2943_v5, 20.0  ;;  %v1531_v10 = vadd.f32 %v2874_v36, %v1530_v7  ;;  %vm1663_vm2 = vcmp.gt.f32.partialorder %v2943_v5, 20.0 }
 0x1ae   :  { %v1963_v12 = vpop.eup %1962  ;;  %v1690_v13 = vmul.f32 1.442695, %v1672_v8  ;;  %v1704_v14 = vmul.f32 1.442695, %v1679_v9  ;;  %1943 = vmatmul.msk.f32.gmra.mxu3 %vm149_vm0, %v1531_v10  ;;  %vm1656_vm0 = vcmp.gt.f32.partialorder %v2940_v55, 20.0 }
 0x1af   :  { %v1965_v15 = vpop.eup %1964  ;;  %v1727_v17 = vadd.f32 1.0, %v1963_v12  ;;  %v1730_v18 = vmul.f32 -0.5, %v1963_v12  ;;  %v1733_v27 = vand.u32 2147483647, %v1963_v12 }
 0x1b0   :  { %v1967_v19 = vpop.eup %1966  ;;  %v1720_v20 = vmul.f32 0.6931472, %v1965_v15  ;;  %1968 = vpow2.f32 %v1690_v13 }
 0x1b1   :  { %1970 = vlog2.f32 %v1727_v17  ;;  %v1790_v21 = vadd.f32 1.0, %v1967_v19  ;;  %v1615_v36 = vpop.f32.mrf.mxu1  ;;  %v1636_v22 = vpop.f32.mrf.mxu3  ;;  %v1731_v24 = vadd.f32 1.0, %v1730_v18  ;;  %v1793_v25 = vmul.f32 -0.5, %v1967_v19 }
 0x1b2   :  { %v1726_v23 = vsel %vm2949_vm9, %v1723_v11, %v1720_v20  ;;  %1972 = vpow2.f32 %v1704_v14  ;;  %v2956_v28 = vadd.f32 %v2927_v49, %v1615_v36  ;;  %v1796_v29 = vand.u32 2147483647, %v1967_v19 }
 0x1b3   :  { %v1862_v26 = vsel %vm1654_vm10, %v1607_v51, %v1726_v23  ;;  %1974 = vlog2.f32 %v1790_v21  ;;  %v2959_v30 = vadd.f32 %v2927_v49, %v1636_v22  ;;  %v1794_v31 = vadd.f32 1.0, %v1793_v25 }
 0x1b4   :  { %1878 = vst [vmem:[#allocation2] sm:$0xff] %v1862_v26  ;;  %v1673_v32 = vmin.f32 %v2956_v28, 20.0  ;;  %v1732_v33 = vmul.f32 %v1963_v12, %v1731_v24  ;;  %vm2964_vm12 = vcmp.lt.f32.partialorder %v1733_v27, 0.0004427343  ;;  %vm2968_vm13 = vcmp.lt.f32.partialorder %v1796_v29, 0.0004427343 }
 0x1b5   :  { %v1680_v34 = vmin.f32 %v2959_v30, 20.0  ;;  %v1795_v38 = vmul.f32 %v1967_v19, %v1794_v31  ;;  %vm1657_vm4 = vcmp.gt.f32.partialorder %v2956_v28, 20.0  ;;  %vm1664_vm5 = vcmp.gt.f32.partialorder %v2959_v30, 20.0 }
 0x1b6   :  { %v1969_v35 = vpop.eup %1968  ;;  %v1692_v45 = vmul.f32 1.442695, %v1673_v32 }
 0x1b7   :  { %v1971_v37 = vpop.eup %1970  ;;  %v1736_v40 = vadd.f32 1.0, %v1969_v35  ;;  %v1739_v41 = vmul.f32 -0.5, %v1969_v35  ;;  %v1706_v48 = vmul.f32 1.442695, %v1680_v34  ;;  %v1742_v59 = vand.u32 2147483647, %v1969_v35 }
 0x1b8   :  { %v1973_v42 = vpop.eup %1972  ;;  %v1729_v43 = vmul.f32 0.6931472, %v1971_v37 }
 0x1b9   :  { %v1975_v46 = vpop.eup %1974  ;;  %1976 = vlog2.f32 %v1736_v40  ;;  %v1799_v47 = vadd.f32 1.0, %v1973_v42  ;;  %v1618_v50 = vpop.f32.mrf.mxu1  ;;  %v1740_v53 = vadd.f32 1.0, %v1739_v41  ;;  %v1802_v54 = vmul.f32 -0.5, %v1973_v42 }
 0x1ba   :  { %v1735_v51 = vsel %vm2964_vm12, %v1732_v33, %v1729_v43  ;;  %v1792_v52 = vmul.f32 0.6931472, %v1975_v46  ;;  %v2978_v60 = vadd.f32 %v2927_v49, %v1618_v50  ;;  %v1639_v61 = vpop.f32.mrf.mxu3  ;;  %v1805_v2 = vand.u32 2147483647, %v1973_v42 }
 0x1bb   :  { %v1863_v56 = vsel %vm1655_vm11, %v2932_v57, %v1735_v51  ;;  %1978 = vlog2.f32 %v1799_v47  ;;  %v1741_v57 = vmul.f32 %v1969_v35, %v1740_v53  ;;  %v1803_v1 = vadd.f32 1.0, %v1802_v54 }
 0x1bc   :  { %1879 = vst [vmem:[#allocation2 + $0x8] sm:$0xff] %v1863_v56  ;;  %v1798_v62 = vsel %vm2968_vm13, %v1795_v38, %v1792_v52  ;;  %1980 = vpow2.f32 %v1692_v45  ;;  %v1674_v0 = vmin.f32 %v2978_v60, 20.0  ;;  %v2986_v3 = vadd.f32 %v2927_v49, %v1639_v61 }
 0x1bd   :  { %v1870_v63 = vsel %vm1662_vm14, %v2935_v58, %v1798_v62  ;;  %1982 = vpow2.f32 %v1706_v48  ;;  %vm1743_vm15 = vcmp.lt.f32.partialorder %v1742_v59, 0.0004427343  ;;  %v1804_v11 = vmul.f32 %v1973_v42, %v1803_v1 }
 0x1be   :  { %1886 = vst [vmem:[#allocation2 + $0x40] sm:$0xff] %v1870_v63  ;;  %v1694_v6 = vmul.f32 1.442695, %v1674_v0  ;;  %v1681_v8 = vmin.f32 %v2986_v3, 20.0  ;;  %vm1806_vm1 = vcmp.lt.f32.partialorder %v1805_v2, 0.0004427343 }
 0x1bf   :  { %v1977_v4 = vpop.eup %1976  ;;  %vm1658_vm8 = vcmp.gt.f32.partialorder %v2978_v60, 20.0  ;;  %vm1665_vm10 = vcmp.gt.f32.partialorder %v2986_v3, 20.0 }
 0x1c0   :  { %v1738_v7 = vmul.f32 0.6931472, %v1977_v4  ;;  %1984 = vpow2.f32 %v1694_v6  ;;  %v1708_v17 = vmul.f32 1.442695, %v1681_v8 }
 0x1c1   :  { %v1979_v9 = vpop.eup %1978 }
 0x1c2   :  { %v1981_v58 = vpop.eup %1980  ;;  %v1744_v10 = vsel %vm1743_vm15, %v1741_v57, %v1738_v7  ;;  %v1801_v12 = vmul.f32 0.6931472, %v1979_v9 }
 0x1c3   :  { %v1983_v13 = vpop.eup %1982  ;;  %v1864_v14 = vsel %vm1656_vm0, %v2940_v55, %v1744_v10  ;;  %v1745_v15 = vadd.f32 1.0, %v1981_v58  ;;  %v1748_v16 = vmul.f32 -0.5, %v1981_v58  ;;  %v1751_v23 = vand.u32 2147483647, %v1981_v58 }
 0x1c4   :  { %1880 = vst [vmem:[#allocation2 + $0x10] sm:$0xff] %v1864_v14  ;;  %v1807_v18 = vsel %vm1806_vm1, %v1804_v11, %v1801_v12  ;;  %v1808_v19 = vadd.f32 1.0, %v1983_v13  ;;  %v1811_v21 = vmul.f32 -0.5, %v1983_v13  ;;  %v1814_v26 = vand.u32 2147483647, %v1983_v13 }
 0x1c5   :  { %v1871_v20 = vsel %vm1663_vm2, %v2943_v5, %v1807_v18  ;;  %1986 = vlog2.f32 %v1745_v15  ;;  %v1749_v36 = vadd.f32 1.0, %v1748_v16  ;;  %vm2996_vm3 = vcmp.lt.f32.partialorder %v1751_v23, 0.0004427343 }
 0x1c6   :  { %1887 = vst [vmem:[#allocation2 + $0x48] sm:$0xff] %v1871_v20  ;;  %1988 = vlog2.f32 %v1808_v19  ;;  %v1985_v22 = vpop.eup %1984  ;;  %v1812_v25 = vadd.f32 1.0, %v1811_v21  ;;  %vm1815_vm6 = vcmp.lt.f32.partialorder %v1814_v26, 0.0004427343 }
 0x1c7   :  { %1990 = vpow2.f32 %v1708_v17  ;;  %v1754_v24 = vadd.f32 1.0, %v1985_v22  ;;  %v1757_v55 = vmul.f32 -0.5, %v1985_v22  ;;  %v1642_v27 = vpop.f32.mrf.mxu3  ;;  %v1750_v29 = vmul.f32 %v1981_v58, %v1749_v36 }
 0x1c8   :  { %v2994_v32 = vadd.f32 %v2927_v49, %v1642_v27  ;;  %v1760_v37 = vand.u32 2147483647, %v1985_v22  ;;  %v1813_v42 = vmul.f32 %v1983_v13, %v1812_v25 }
 0x1c9   :  { %1992 = vlog2.f32 %v1754_v24  ;;  %v1758_v31 = vadd.f32 1.0, %v1757_v55 }
 0x1ca   :  { %v1682_v39 = vmin.f32 %v2994_v32, 20.0  ;;  %vm1761_vm7 = vcmp.lt.f32.partialorder %v1760_v37, 0.0004427343  ;;  %vm1666_vm12 = vcmp.gt.f32.partialorder %v2994_v32, 20.0 }
 0x1cb   :  { %v1987_v5 = vpop.eup %1986  ;;  %v1759_v45 = vmul.f32 %v1985_v22, %v1758_v31 }
 0x1cc   :  { %v1989_v33 = vpop.eup %1988  ;;  %v1747_v34 = vmul.f32 0.6931472, %v1987_v5  ;;  %v1710_v51 = vmul.f32 1.442695, %v1682_v39 }
 0x1cd   :  { %v1991_v40 = vpop.eup %1990  ;;  %v1810_v41 = vmul.f32 0.6931472, %v1989_v33  ;;  %v1621_v43 = vpop.f32.mrf.mxu1 }
 0x1ce   :  { %v1753_v44 = vsel %vm2996_vm3, %v1750_v29, %v1747_v34  ;;  %v1817_v46 = vadd.f32 1.0, %v1991_v40  ;;  %v1820_v38 = vmul.f32 -0.5, %v1991_v40  ;;  %v1622_v50 = vadd.f32 %v2927_v49, %v1621_v43 }
 0x1cf   :  { %v1865_v47 = vsel %vm1657_vm4, %v2956_v28, %v1753_v44  ;;  %v1816_v48 = vsel %vm1815_vm6, %v1813_v42, %v1810_v41  ;;  %v1993_v52 = vpop.eup %1992  ;;  %v1823_v63 = vand.u32 2147483647, %v1991_v40 }
 0x1d0   :  { %1881 = vst [vmem:[#allocation2 + $0x18] sm:$0xff] %v1865_v47  ;;  %v1872_v53 = vsel %vm1664_vm5, %v2959_v30, %v1816_v48  ;;  %1994 = vlog2.f32 %v1817_v46  ;;  %v1756_v54 = vmul.f32 0.6931472, %v1993_v52  ;;  %v1675_v56 = vmin.f32 %v1622_v50, 20.0 }
 0x1d1   :  { %1888 = vst [vmem:[#allocation2 + $0x50] sm:$0xff] %v1872_v53  ;;  %1996 = vpow2.f32 %v1710_v51  ;;  %v1821_v61 = vadd.f32 1.0, %v1820_v38  ;;  %vm1824_vm9 = vcmp.lt.f32.partialorder %v1823_v63, 0.0004427343  ;;  %vm1659_vm14 = vcmp.gt.f32.partialorder %v1622_v50, 20.0 }
 0x1d2   :  { %v1762_v59 = vsel %vm1761_vm7, %v1759_v45, %v1756_v54  ;;  %v1696_v62 = vmul.f32 1.442695, %v1675_v56 }
 0x1d3   :  { %v1866_v28 = vsel %vm1658_vm8, %v2978_v60, %v1762_v59  ;;  %v1822_v30 = vmul.f32 %v1991_v40, %v1821_v61 }
 0x1d4   :  { %1882 = vst [vmem:[#allocation2 + $0x20] sm:$0xff] %v1866_v28  ;;  %1998 = vpow2.f32 %v1696_v62 }
 0x1d6   :  { %v1995_v0 = vpop.eup %1994 }
 0x1d7   :  { %v1997_v57 = vpop.eup %1996  ;;  %v1819_v1 = vmul.f32 0.6931472, %v1995_v0 }
 0x1d8   :  { %v1826_v2 = vadd.f32 1.0, %v1997_v57  ;;  %v1829_v6 = vmul.f32 -0.5, %v1997_v57  ;;  %v1832_v10 = vand.u32 2147483647, %v1997_v57 }
 0x1d9   :  { %v1825_v4 = vsel %vm1824_vm9, %v1822_v30, %v1819_v1 }
 0x1da   :  { %v1873_v7 = vsel %vm1665_vm10, %v2986_v3, %v1825_v4  ;;  %2000 = vlog2.f32 %v1826_v2  ;;  %v1999_v8 = vpop.eup %1998  ;;  %v1830_v58 = vadd.f32 1.0, %v1829_v6  ;;  %vm1833_vm11 = vcmp.lt.f32.partialorder %v1832_v10, 0.0004427343 }
 0x1db   :  { %1889 = vst [vmem:[#allocation2 + $0x58] sm:$0xff] %v1873_v7  ;;  %v1763_v9 = vadd.f32 1.0, %v1999_v8  ;;  %v1766_v60 = vmul.f32 -0.5, %v1999_v8  ;;  %v1769_v13 = vand.u32 2147483647, %v1999_v8 }
 0x1dc   :  { %v1831_v15 = vmul.f32 %v1997_v57, %v1830_v58 }
 0x1dd   :  { %2002 = vlog2.f32 %v1763_v9  ;;  %v1767_v12 = vadd.f32 1.0, %v1766_v60  ;;  %vm1770_vm13 = vcmp.lt.f32.partialorder %v1769_v13, 0.0004427343 }
 0x1df   :  { %v1768_v16 = vmul.f32 %v1999_v8, %v1767_v12 }
 0x1e0   :  { %v2001_v11 = vpop.eup %2000 }
 0x1e1   :  { %v1828_v14 = vmul.f32 0.6931472, %v2001_v11 }
 0x1e3   :  { %v1834_v17 = vsel %vm1833_vm11, %v1831_v15, %v1828_v14  ;;  %v2003_v18 = vpop.eup %2002 }
 0x1e4   :  { %v1874_v3 = vsel %vm1666_vm12, %v2994_v32, %v1834_v17  ;;  %v1765_v19 = vmul.f32 0.6931472, %v2003_v18 }
 0x1e5   :  { %1890 = vst [vmem:[#allocation2 + $0x60] sm:$0xff] %v1874_v3 }
 0x1e6   :  { %v1771_v20 = vsel %vm1770_vm13, %v1768_v16, %v1765_v19 }
 0x1e7   :  { %v1867_v21 = vsel %vm1659_vm14, %v1622_v50, %v1771_v20 }
 0x1e8   :  { %1883 = vst [vmem:[#allocation2 + $0x28] sm:$0xff] %v1867_v21 }
 0x1eb   :  { %v1645_v36 = vpop.f32.mrf.mxu3 }
 0x1ec   :  { %v1646_v22 = vadd.f32 %v2927_v49, %v1645_v36 }
 0x1ee   :  { %v1683_v23 = vmin.f32 %v1646_v22, 20.0  ;;  %vm1667_vm0 = vcmp.gt.f32.partialorder %v1646_v22, 20.0 }
 0x1f0   :  { %v1624_v24 = vpop.f32.mrf.mxu1  ;;  %v1712_v55 = vmul.f32 1.442695, %v1683_v23 }
 0x1f1   :  { %v1625_v25 = vadd.f32 %v2927_v49, %v1624_v24 }
 0x1f2   :  { %2004 = vpow2.f32 %v1712_v55 }
 0x1f3   :  { %v1676_v26 = vmin.f32 %v1625_v25, 20.0  ;;  %vm1660_vm2 = vcmp.gt.f32.partialorder %v1625_v25, 20.0 }
 0x1f5   :  { %v1698_v27 = vmul.f32 1.442695, %v1676_v26 }
 0x1f7   :  { %2006 = vpow2.f32 %v1698_v27 }
 0x1f8   :  { %v2005_v29 = vpop.eup %2004 }
 0x1f9   :  { %v1835_v31 = vadd.f32 1.0, %v2005_v29  ;;  %v1838_v32 = vmul.f32 -0.5, %v2005_v29  ;;  %v1841_v37 = vand.u32 2147483647, %v2005_v29 }
 0x1fb   :  { %2008 = vlog2.f32 %v1835_v31  ;;  %v1839_v34 = vadd.f32 1.0, %v1838_v32  ;;  %vm1842_vm15 = vcmp.lt.f32.partialorder %v1841_v37, 0.0004427343 }
 0x1fd   :  { %v2007_v5 = vpop.eup %2006  ;;  %v1840_v43 = vmul.f32 %v2005_v29, %v1839_v34 }
 0x1fe   :  { %v1772_v35 = vadd.f32 1.0, %v2007_v5  ;;  %v1775_v33 = vmul.f32 -0.5, %v2007_v5  ;;  %v1778_v41 = vand.u32 2147483647, %v2007_v5 }
 0x200   :  { %2010 = vlog2.f32 %v1772_v35  ;;  %v1776_v40 = vadd.f32 1.0, %v1775_v33  ;;  %vm1779_vm1 = vcmp.lt.f32.partialorder %v1778_v41, 0.0004427343 }
 0x201   :  { %v2009_v39 = vpop.eup %2008 }
 0x202   :  { %v1837_v42 = vmul.f32 0.6931472, %v2009_v39  ;;  %v1777_v45 = vmul.f32 %v2007_v5, %v1776_v40 }
 0x204   :  { %v1843_v44 = vsel %vm1842_vm15, %v1840_v43, %v1837_v42 }
 0x205   :  { %v1875_v46 = vsel %vm1667_vm0, %v1646_v22, %v1843_v44 }
 0x206   :  { %v2011_v38 = vpop.eup %2010  ;;  %1891 = vst [vmem:[#allocation2 + $0x68] sm:$0xff] %v1875_v46 }
 0x207   :  { %v1774_v47 = vmul.f32 0.6931472, %v2011_v38 }
 0x209   :  { %v1780_v48 = vsel %vm1779_vm1, %v1777_v45, %v1774_v47 }
 0x20a   :  { %v1868_v50 = vsel %vm1660_vm2, %v1625_v25, %v1780_v48 }
 0x20b   :  { %1884 = vst [vmem:[#allocation2 + $0x30] sm:$0xff] %v1868_v50 }
 0x20d   :  { %v1648_v51 = vpop.f32.mrf.mxu3 }
 0x20e   :  { %v1649_v52 = vadd.f32 %v2927_v49, %v1648_v51 }
 0x210   :  { %v1684_v53 = vmin.f32 %v1649_v52, 20.0  ;;  %vm1668_vm4 = vcmp.gt.f32.partialorder %v1649_v52, 20.0 }
 0x212   :  { %v1714_v54 = vmul.f32 1.442695, %v1684_v53 }
 0x213   :  { %v1627_v56 = vpop.f32.mrf.mxu1 }
 0x214   :  { %2012 = vpow2.f32 %v1714_v54  ;;  %v1628_v59 = vadd.f32 %v2927_v49, %v1627_v56 }
 0x216   :  { %v1677_v61 = vmin.f32 %v1628_v59, 20.0  ;;  %vm1661_vm6 = vcmp.gt.f32.partialorder %v1628_v59, 20.0 }
 0x218   :  { %v1700_v62 = vmul.f32 1.442695, %v1677_v61 }
 0x21a   :  { %v2013_v28 = vpop.eup %2012  ;;  %2014 = vpow2.f32 %v1700_v62 }
 0x21b   :  { %v1844_v63 = vadd.f32 1.0, %v2013_v28  ;;  %v1847_v0 = vmul.f32 -0.5, %v2013_v28  ;;  %v1850_v30 = vand.u32 2147483647, %v2013_v28 }
 0x21d   :  { %2016 = vlog2.f32 %v1844_v63  ;;  %v1848_v57 = vadd.f32 1.0, %v1847_v0  ;;  %vm1851_vm3 = vcmp.lt.f32.partialorder %v1850_v30, 0.0004427343 }
 0x21f   :  { %v1849_v8 = vmul.f32 %v2013_v28, %v1848_v57 }
 0x220   :  { %v2015_v1 = vpop.eup %2014 }
 0x221   :  { %v1781_v2 = vadd.f32 1.0, %v2015_v1  ;;  %v1784_v4 = vmul.f32 -0.5, %v2015_v1  ;;  %v1787_v60 = vand.u32 2147483647, %v2015_v1 }
 0x223   :  { %v2017_v6 = vpop.eup %2016  ;;  %2018 = vlog2.f32 %v1781_v2  ;;  %v1785_v9 = vadd.f32 1.0, %v1784_v4  ;;  %vm1788_vm5 = vcmp.lt.f32.partialorder %v1787_v60, 0.0004427343 }
 0x224   :  { %v1846_v7 = vmul.f32 0.6931472, %v2017_v6 }
 0x225   :  { %v1786_v12 = vmul.f32 %v2015_v1, %v1785_v9 }
 0x226   :  { %v1852_v58 = vsel %vm1851_vm3, %v1849_v8, %v1846_v7 }
 0x227   :  { %v1876_v10 = vsel %vm1668_vm4, %v1649_v52, %v1852_v58 }
 0x228   :  { %1892 = vst [vmem:[#allocation2 + $0x70] sm:$0xff] %v1876_v10 }
 0x229   :  { %v2019_v11 = vpop.eup %2018 }
 0x22a   :  { %v1783_v13 = vmul.f32 0.6931472, %v2019_v11 }
 0x22c   :  { %v1789_v14 = vsel %vm1788_vm5, %v1786_v12, %v1783_v13 }
 0x22d   :  { %v1869_v15 = vsel %vm1661_vm6, %v1628_v59, %v1789_v14 }
 0x22e   :  { %1885 = vst [vmem:[#allocation2 + $0x38] sm:$0xff] %v1869_v15 }
 0x231   :  { %v1651_v16 = vpop.f32.mrf.mxu3 }
 0x232   :  { %v1652_v17 = vadd.f32 %v2927_v49, %v1651_v16 }
 0x234   :  { %v1685_v18 = vmin.f32 %v1652_v17, 20.0  ;;  %vm1669_vm8 = vcmp.gt.f32.partialorder %v1652_v17, 20.0 }
 0x236   :  { %v1716_v3 = vmul.f32 1.442695, %v1685_v18 }
 0x238   :  { %2020 = vpow2.f32 %v1716_v3 }
 0x23e   :  { %v2021_v19 = vpop.eup %2020 }
 0x23f   :  { %v1853_v20 = vadd.f32 1.0, %v2021_v19  ;;  %v1856_v21 = vmul.f32 -0.5, %v2021_v19  ;;  %v1859_v22 = vand.u32 2147483647, %v2021_v19 }
 0x241   :  { %2022 = vlog2.f32 %v1853_v20  ;;  %v1857_v36 = vadd.f32 1.0, %v1856_v21  ;;  %vm1860_vm7 = vcmp.lt.f32.partialorder %v1859_v22, 0.0004427343 }
 0x243   :  { %v1858_v55 = vmul.f32 %v2021_v19, %v1857_v36 }
 0x247   :  { %v2023_v23 = vpop.eup %2022 }
 0x248   :  { %v1855_v24 = vmul.f32 0.6931472, %v2023_v23 }
 0x24a   :  { %v1861_v49 = vsel %vm1860_vm7, %v1858_v55, %v1855_v24 }
 0x24b   :  { %v1877_v25 = vsel %vm1669_vm8, %v1652_v17, %v1861_v49 }
 0x24c   :  { %1893 = vst [vmem:[#allocation2 + $0x78] sm:$0xff] %v1877_v25 }
 0x24d   :  { %1906 = dma.vmem_to_hbm [thread:$0]  %s1899_s6, 2048, %s1901_s9, [#allocation3], %s2052_s10, %s2052_s10, %s2053_s11  }
 0x24e   :  { %2048 = dma.done.wait [#allocation3], 2048  }
 0x24f   :  { %2049 = vsyncadd [#allocation3], 4294965248 }
 0x250   :  { %1911 = vsyncpa [#allocation3], 1 }

</bundles_post_ra>
